<compile_context>
chip_gen: v7x
topology: tpu7x:2x2x1
jax: 0.10.0
libtpu: 0.0.40
codegen_flags: <defaults>
</compile_context>

<pallas_src>
import jax
import jax.numpy as jnp
from jax.experimental import pallas as pl
from jax.experimental.pallas import tpu as pltpu

# --- ORCA(control='pwm') / Dynamic(**params) physical constants (apacrace ORCA 1:43 car) ---
MASS = 0.041
LF = 0.029
LR = 0.033
IZ = 27.8e-6
CM1 = 0.287
CM2 = 0.0545
DELTAT = 0.01                      # DynamicModel default deltat
DT_OVER_MASS = DELTAT / MASS       # folded  (... )/MASS * DELTAT
DT_OVER_IZ = DELTAT / IZ           # folded  (... )/IZ   * DELTAT

# Packed parameter layout (40 scalars):
#   [0]     Rx.weight   [1]      Rx.bias
#   [2:8]   Fy.w1 (6)   [8:14]   Fy.b1 (6)   [14:20] Fy.w2 (6)   [20] Fy.b2
#   [21:27] Ry.w1 (6)   [27:33]  Ry.b1 (6)   [33:39] Ry.w2 (6)   [39] Ry.b2
_N_PARAMS = 40


def dynamic_model_kernel(x_ref, p_ref, out_ref):
    # x_ref:   (6, TB) VMEM, rows = [pwm, deltatheta, theta, vx, vy, w]
    # p_ref:   (40,)   SMEM, packed Rx / Fy / Ry parameters
    # out_ref: (3, TB) VMEM, rows = [d_vx, d_vy, d_w]
    pwm = x_ref[0:1, :]
    theta = x_ref[2:3, :]
    vx0 = x_ref[3:4, :]
    vy0 = x_ref[4:5, :]
    w0 = x_ref[5:6, :]

    # Scalar parameter reads from SMEM (broadcast into vector ops for free).
    rx_w = p_ref[0]
    rx_b = p_ref[1]
    fy_w1 = [p_ref[2 + j] for j in range(6)]
    fy_b1 = [p_ref[8 + j] for j in range(6)]
    fy_w2 = [p_ref[14 + j] for j in range(6)]
    fy_b2 = p_ref[20]
    ry_w1 = [p_ref[21 + j] for j in range(6)]
    ry_b1 = [p_ref[27 + j] for j in range(6)]
    ry_w2 = [p_ref[33 + j] for j in range(6)]
    ry_b2 = p_ref[39]

    def mlp_1_6_1(a, w1, b1, w2, b2):
        # Linear(1,6) -> ReLU -> Linear(6,1), unrolled over the 6 hidden units with
        # scalar weights; every intermediate stays a lane-dense (1, TB) vector.
        acc = None
        for j in range(6):
            h = jnp.maximum(a * w1[j] + b1[j], 0.0)
            t = h * w2[j]
            acc = t if acc is None else acc + t
        return acc + b2

    # Loop-invariant terms hoisted out of the two Euler refinement steps
    # (Mosaic does not reliably CSE them across the unrolled iterations).
    sin_t = jnp.sin(theta)
    cos_t = jnp.cos(theta)
    lf_cos_t = LF * cos_t
    cm1_pwm = CM1 * pwm
    cm2_pwm = CM2 * pwm

    d_vx = jnp.zeros_like(vx0)
    d_vy = jnp.zeros_like(vx0)
    d_w = jnp.zeros_like(vx0)

    # Two fixed Euler refinement steps (unrolled, as in the PyTorch forward).
    for _ in range(2):
        vx = vx0 + d_vx
        vy = vy0 + d_vy
        w = w0 + d_w

        # Keep arctan2 (exact forward semantics; valid for vx <= 0 too).
        alpha_f = theta - jnp.arctan2(w * LF + vy, vx)
        alpha_r = jnp.arctan2(w * LR - vy, vx)

        Ffy = mlp_1_6_1(alpha_f, fy_w1, fy_b1, fy_w2, fy_b2)
        Fry = mlp_1_6_1(alpha_r, ry_w1, ry_b1, ry_w2, ry_b2)
        Frx = (vx * vx) * rx_w + rx_b + cm1_pwm - vx * cm2_pwm

        # d_* += *_dot * DELTAT with the constant divisions folded in:
        #   (Frx - Ffy*sin + MASS*vy*w)/MASS * DT = (Frx - Ffy*sin)*DT/MASS + vy*w*DT
        d_vx = d_vx + (Frx - Ffy * sin_t) * DT_OVER_MASS + (vy * w) * DELTAT
        d_vy = d_vy + (Fry + Ffy * cos_t) * DT_OVER_MASS - (vx * w) * DELTAT
        d_w = d_w + (Ffy * lf_cos_t - Fry * LR) * DT_OVER_IZ

    # Lane-dense row stores (no lane-axis concatenate, no masked partial stores).
    out_ref[0:1, :] = d_vx
    out_ref[1:2, :] = d_vy
    out_ref[2:3, :] = d_w


def pack_params(p):
    """Pack the 10 tiny Rx/Ry/Fy arrays into one (40,) float32 vector (single SMEM DMA)."""
    return jnp.concatenate([
        p["rx_w"].reshape(-1), p["rx_b"].reshape(-1),
        p["fy_w1"].reshape(-1), p["fy_b1"].reshape(-1),
        p["fy_w2"].reshape(-1), p["fy_b2"].reshape(-1),
        p["ry_w1"].reshape(-1), p["ry_b1"].reshape(-1),
        p["ry_w2"].reshape(-1), p["ry_b2"].reshape(-1),
    ]).astype(jnp.float32)


def make_params(key, randomize_output_head=False):
    """Parameters mirroring DynamicModel.__init__.

    Faithful init: Rx = Linear(1,1) (random here), Ry/Fy first layer weight=1,
    bias=arange(-0.6, 0.6, 0.2), second layer weight=0 bias=0.  With
    randomize_output_head=True the (otherwise zero) output layers get small random
    values so the test exercises the full MLP path.
    """
    k1, k2, k3, k4, k5, k6 = jax.random.split(key, 6)
    f32 = jnp.float32
    b1 = (-0.6 + 0.2 * jnp.arange(6, dtype=f32)).reshape(1, 6)
    if randomize_output_head:
        ry_w2 = 0.1 * jax.random.normal(k3, (1, 6), f32)
        ry_b2 = 0.1 * jax.random.normal(k4, (1, 1), f32)
        fy_w2 = 0.1 * jax.random.normal(k5, (1, 6), f32)
        fy_b2 = 0.1 * jax.random.normal(k6, (1, 1), f32)
    else:
        ry_w2 = jnp.zeros((1, 6), f32)
        ry_b2 = jnp.zeros((1, 1), f32)
        fy_w2 = jnp.zeros((1, 6), f32)
        fy_b2 = jnp.zeros((1, 1), f32)
    return dict(
        rx_w=jax.random.uniform(k1, (1, 1), f32, -1.0, 1.0),
        rx_b=jax.random.uniform(k2, (1, 1), f32, -1.0, 1.0),
        ry_w1=jnp.ones((1, 6), f32), ry_b1=b1, ry_w2=ry_w2, ry_b2=ry_b2,
        fy_w1=jnp.ones((1, 6), f32), fy_b1=b1, fy_w2=fy_w2, fy_b2=fy_b2,
    )


def dynamic_model(x, p, max_tile_b=2048):
    """x: (B, 6) [pwm, deltatheta, theta, vx, vy, w]  ->  (B, 3) [d_vx, d_vy, d_w]."""
    assert max_tile_b % 128 == 0
    B = x.shape[0]
    f32 = jnp.float32

    xt = jnp.transpose(x.astype(f32))            # (6, B): batch onto the lane axis
    pvec = pack_params(p)                        # (40,) f32 -> SMEM

    if B <= max_tile_b:
        # Gridless call (no grid-loop scaffolding), lane dim padded to >= 128.
        bp = max(128, ((B + 127) // 128) * 128)
        tb = bp
        grid = None
    else:
        # Lane-tiled "parallel" grid for large MPC batches (2x on v7x megacore).
        tb = max_tile_b
        bp = ((B + tb - 1) // tb) * tb
        grid = (bp // tb,)

    if bp != B:
        xt = jnp.pad(xt, ((0, 0), (0, bp - B)))

    if grid is None:
        out_t = pl.pallas_call(
            dynamic_model_kernel,
            out_shape=jax.ShapeDtypeStruct((3, bp), f32),
            in_specs=[
                pl.BlockSpec(memory_space=pltpu.MemorySpace.VMEM),
                pl.BlockSpec(memory_space=pltpu.MemorySpace.SMEM),
            ],
            out_specs=pl.BlockSpec(memory_space=pltpu.MemorySpace.VMEM),
        )(xt, pvec)
    else:
        out_t = pl.pallas_call(
            dynamic_model_kernel,
            out_shape=jax.ShapeDtypeStruct((3, bp), f32),
            grid=grid,
            in_specs=[
                pl.BlockSpec((6, tb), lambda i: (0, i)),
                pl.BlockSpec(memory_space=pltpu.MemorySpace.SMEM),
            ],
            out_specs=pl.BlockSpec((3, tb), lambda i: (0, i)),
            compiler_params=pltpu.CompilerParams(
                dimension_semantics=("parallel",)),
        )(xt, pvec)

    return jnp.transpose(out_t[:, :B]).astype(x.dtype)   # (B, 3)


# ----------------------------- pure-JAX reference -----------------------------

def _mlp_ref(a, w1, b1, w2, b2):
    h = jnp.maximum(a * w1 + b1, 0.0)                     # (B, 6)
    return jnp.sum(h * w2, axis=-1, keepdims=True) + b2   # (B, 1)


def dynamic_model_ref(x, p):
    """Literal translation of the torch forward (divisions kept as written)."""
    pwm, theta = x[:, 0:1], x[:, 2:3]
    vx0, vy0, w0 = x[:, 3:4], x[:, 4:5], x[:, 5:6]
    d_vx = jnp.zeros_like(vx0)
    d_vy = jnp.zeros_like(vx0)
    d_w = jnp.zeros_like(vx0)
    for _ in range(2):
        vx, vy, w = vx0 + d_vx, vy0 + d_vy, w0 + d_w
        alpha_f = theta - jnp.arctan2(w * LF + vy, vx)
        alpha_r = jnp.arctan2(w * LR - vy, vx)
        Ffy = _mlp_ref(alpha_f, p["fy_w1"], p["fy_b1"], p["fy_w2"], p["fy_b2"])
        Fry = _mlp_ref(alpha_r, p["ry_w1"], p["ry_b1"], p["ry_w2"], p["ry_b2"])
        Frx = (vx * vx) * p["rx_w"] + p["rx_b"]
        Frx = (CM1 - CM2 * vx) * pwm + Frx
        vx_dot = (Frx - Ffy * jnp.sin(theta) + MASS * vy * w) / MASS
        vy_dot = (Fry + Ffy * jnp.cos(theta) - MASS * vx * w) / MASS
        w_dot = (Ffy * LF * jnp.cos(theta) - Fry * LR) / IZ
        d_vx = d_vx + vx_dot * DELTAT
        d_vy = d_vy + vy_dot * DELTAT
        d_w = d_w + w_dot * DELTAT
    return jnp.concatenate([d_vx, d_vy, d_w], axis=1)


if __name__ == "__main__":
    key = jax.random.PRNGKey(0)
    k_x, k_p, k_x2 = jax.random.split(key, 3)

    def make_x(k, b):
        cols = jax.random.split(k, 6)
        return jnp.stack([
            jax.random.uniform(cols[0], (b,), jnp.float32, 0.0, 1.0),    # pwm
            jax.random.uniform(cols[1], (b,), jnp.float32, -0.3, 0.3),   # deltatheta (unused)
            jax.random.uniform(cols[2], (b,), jnp.float32, -0.3, 0.3),   # theta (steering)
            jax.random.uniform(cols[3], (b,), jnp.float32, 0.5, 2.0),    # vx
            jax.random.uniform(cols[4], (b,), jnp.float32, -0.2, 0.2),   # vy
            jax.random.uniform(cols[5], (b,), jnp.float32, -1.0, 1.0),   # w
        ], axis=1)

    params = make_params(k_p, randomize_output_head=True)

    # Small batch -> gridless, lane-padded call.
    x_small = make_x(k_x, 8)
    out_small = dynamic_model(x_small, params)
    jax.block_until_ready(out_small)
    ref_small = dynamic_model_ref(x_small, params)
    assert out_small.shape == (8, 3)
    assert jnp.allclose(out_small, ref_small, atol=1e-3, rtol=1e-3), (out_small, ref_small)

    # Larger batch with a small tile -> exercises the lane-tiled "parallel" grid path.
    x_big = make_x(k_x2, 300)
    out_big = dynamic_model(x_big, params, max_tile_b=128)
    jax.block_until_ready(out_big)
    ref_big = dynamic_model_ref(x_big, params)
    assert out_big.shape == (300, 3)
    assert jnp.allclose(out_big, ref_big, atol=1e-3, rtol=1e-3), (out_big, ref_big)

    print("KERNEL_OK")
</pallas_src>

<mosaic_0001>
module attributes {stable_mosaic.version = 11 : i64} {
  func.func @dynamic_model_kernel(%arg0: memref<6x128xf32, #tpu.memory_space<vmem>>, %arg1: memref<40xf32, #tpu.memory_space<smem>>, %arg2: memref<3x128xf32, #tpu.memory_space<vmem>>) attributes {dimension_semantics = [], scalar_prefetch = 0 : i64, scratch_operands = 0 : i64, tpu.core_type = #tpu.core_type<tc>} {
    %c0 = arith.constant 0 : index
    %c0_0 = arith.constant 0 : index
    %0 = vector.load %arg0[%c0, %c0_0] : memref<6x128xf32, #tpu.memory_space<vmem>>, vector<1x128xf32>
    %c2 = arith.constant 2 : index
    %c0_1 = arith.constant 0 : index
    %1 = vector.load %arg0[%c2, %c0_1] : memref<6x128xf32, #tpu.memory_space<vmem>>, vector<1x128xf32>
    %c3 = arith.constant 3 : index
    %c0_2 = arith.constant 0 : index
    %2 = vector.load %arg0[%c3, %c0_2] : memref<6x128xf32, #tpu.memory_space<vmem>>, vector<1x128xf32>
    %c4 = arith.constant 4 : index
    %c0_3 = arith.constant 0 : index
    %3 = vector.load %arg0[%c4, %c0_3] : memref<6x128xf32, #tpu.memory_space<vmem>>, vector<1x128xf32>
    %c5 = arith.constant 5 : index
    %c0_4 = arith.constant 0 : index
    %4 = vector.load %arg0[%c5, %c0_4] : memref<6x128xf32, #tpu.memory_space<vmem>>, vector<1x128xf32>
    %c0_5 = arith.constant 0 : index
    %5 = memref.load %arg1[%c0_5] : memref<40xf32, #tpu.memory_space<smem>>
    %c1 = arith.constant 1 : index
    %6 = memref.load %arg1[%c1] : memref<40xf32, #tpu.memory_space<smem>>
    %c2_6 = arith.constant 2 : index
    %7 = memref.load %arg1[%c2_6] : memref<40xf32, #tpu.memory_space<smem>>
    %c3_7 = arith.constant 3 : index
    %8 = memref.load %arg1[%c3_7] : memref<40xf32, #tpu.memory_space<smem>>
    %c4_8 = arith.constant 4 : index
    %9 = memref.load %arg1[%c4_8] : memref<40xf32, #tpu.memory_space<smem>>
    %c5_9 = arith.constant 5 : index
    %10 = memref.load %arg1[%c5_9] : memref<40xf32, #tpu.memory_space<smem>>
    %c6 = arith.constant 6 : index
    %11 = memref.load %arg1[%c6] : memref<40xf32, #tpu.memory_space<smem>>
    %c7 = arith.constant 7 : index
    %12 = memref.load %arg1[%c7] : memref<40xf32, #tpu.memory_space<smem>>
    %c8 = arith.constant 8 : index
    %13 = memref.load %arg1[%c8] : memref<40xf32, #tpu.memory_space<smem>>
    %c9 = arith.constant 9 : index
    %14 = memref.load %arg1[%c9] : memref<40xf32, #tpu.memory_space<smem>>
    %c10 = arith.constant 10 : index
    %15 = memref.load %arg1[%c10] : memref<40xf32, #tpu.memory_space<smem>>
    %c11 = arith.constant 11 : index
    %16 = memref.load %arg1[%c11] : memref<40xf32, #tpu.memory_space<smem>>
    %c12 = arith.constant 12 : index
    %17 = memref.load %arg1[%c12] : memref<40xf32, #tpu.memory_space<smem>>
    %c13 = arith.constant 13 : index
    %18 = memref.load %arg1[%c13] : memref<40xf32, #tpu.memory_space<smem>>
    %c14 = arith.constant 14 : index
    %19 = memref.load %arg1[%c14] : memref<40xf32, #tpu.memory_space<smem>>
    %c15 = arith.constant 15 : index
    %20 = memref.load %arg1[%c15] : memref<40xf32, #tpu.memory_space<smem>>
    %c16 = arith.constant 16 : index
    %21 = memref.load %arg1[%c16] : memref<40xf32, #tpu.memory_space<smem>>
    %c17 = arith.constant 17 : index
    %22 = memref.load %arg1[%c17] : memref<40xf32, #tpu.memory_space<smem>>
    %c18 = arith.constant 18 : index
    %23 = memref.load %arg1[%c18] : memref<40xf32, #tpu.memory_space<smem>>
    %c19 = arith.constant 19 : index
    %24 = memref.load %arg1[%c19] : memref<40xf32, #tpu.memory_space<smem>>
    %c20 = arith.constant 20 : index
    %25 = memref.load %arg1[%c20] : memref<40xf32, #tpu.memory_space<smem>>
    %c21 = arith.constant 21 : index
    %26 = memref.load %arg1[%c21] : memref<40xf32, #tpu.memory_space<smem>>
    %c22 = arith.constant 22 : index
    %27 = memref.load %arg1[%c22] : memref<40xf32, #tpu.memory_space<smem>>
    %c23 = arith.constant 23 : index
    %28 = memref.load %arg1[%c23] : memref<40xf32, #tpu.memory_space<smem>>
    %c24 = arith.constant 24 : index
    %29 = memref.load %arg1[%c24] : memref<40xf32, #tpu.memory_space<smem>>
    %c25 = arith.constant 25 : index
    %30 = memref.load %arg1[%c25] : memref<40xf32, #tpu.memory_space<smem>>
    %c26 = arith.constant 26 : index
    %31 = memref.load %arg1[%c26] : memref<40xf32, #tpu.memory_space<smem>>
    %c27 = arith.constant 27 : index
    %32 = memref.load %arg1[%c27] : memref<40xf32, #tpu.memory_space<smem>>
    %c28 = arith.constant 28 : index
    %33 = memref.load %arg1[%c28] : memref<40xf32, #tpu.memory_space<smem>>
    %c29 = arith.constant 29 : index
    %34 = memref.load %arg1[%c29] : memref<40xf32, #tpu.memory_space<smem>>
    %c30 = arith.constant 30 : index
    %35 = memref.load %arg1[%c30] : memref<40xf32, #tpu.memory_space<smem>>
    %c31 = arith.constant 31 : index
    %36 = memref.load %arg1[%c31] : memref<40xf32, #tpu.memory_space<smem>>
    %c32 = arith.constant 32 : index
    %37 = memref.load %arg1[%c32] : memref<40xf32, #tpu.memory_space<smem>>
    %c33 = arith.constant 33 : index
    %38 = memref.load %arg1[%c33] : memref<40xf32, #tpu.memory_space<smem>>
    %c34 = arith.constant 34 : index
    %39 = memref.load %arg1[%c34] : memref<40xf32, #tpu.memory_space<smem>>
    %c35 = arith.constant 35 : index
    %40 = memref.load %arg1[%c35] : memref<40xf32, #tpu.memory_space<smem>>
    %c36 = arith.constant 36 : index
    %41 = memref.load %arg1[%c36] : memref<40xf32, #tpu.memory_space<smem>>
    %c37 = arith.constant 37 : index
    %42 = memref.load %arg1[%c37] : memref<40xf32, #tpu.memory_space<smem>>
    %c38 = arith.constant 38 : index
    %43 = memref.load %arg1[%c38] : memref<40xf32, #tpu.memory_space<smem>>
    %c39 = arith.constant 39 : index
    %44 = memref.load %arg1[%c39] : memref<40xf32, #tpu.memory_space<smem>>
    %45 = math.sin %1 : vector<1x128xf32>
    %46 = math.cos %1 : vector<1x128xf32>
    %cst = arith.constant 2.900000e-02 : f32
    %47 = vector.broadcast %cst : f32 to vector<1x128xf32>
    %48 = arith.mulf %47, %46 : vector<1x128xf32>
    %cst_10 = arith.constant 2.870000e-01 : f32
    %49 = vector.broadcast %cst_10 : f32 to vector<1x128xf32>
    %50 = arith.mulf %49, %0 : vector<1x128xf32>
    %cst_11 = arith.constant 5.450000e-02 : f32
    %51 = vector.broadcast %cst_11 : f32 to vector<1x128xf32>
    %52 = arith.mulf %51, %0 : vector<1x128xf32>
    %cst_12 = arith.constant 0.000000e+00 : f32
    %53 = vector.broadcast %cst_12 : f32 to vector<1x128xf32>
    %cst_13 = arith.constant 0.000000e+00 : f32
    %54 = vector.broadcast %cst_13 : f32 to vector<1x128xf32>
    %cst_14 = arith.constant 0.000000e+00 : f32
    %55 = vector.broadcast %cst_14 : f32 to vector<1x128xf32>
    %56 = arith.addf %2, %53 : vector<1x128xf32>
    %57 = arith.addf %3, %54 : vector<1x128xf32>
    %58 = arith.addf %4, %55 : vector<1x128xf32>
    %cst_15 = arith.constant 2.900000e-02 : f32
    %59 = vector.broadcast %cst_15 : f32 to vector<1x128xf32>
    %60 = arith.mulf %58, %59 : vector<1x128xf32>
    %61 = arith.addf %60, %57 : vector<1x128xf32>
    %62 = math.atan2 %61, %56 : vector<1x128xf32>
    %63 = arith.subf %1, %62 : vector<1x128xf32>
    %cst_16 = arith.constant 3.300000e-02 : f32
    %64 = vector.broadcast %cst_16 : f32 to vector<1x128xf32>
    %65 = arith.mulf %58, %64 : vector<1x128xf32>
    %66 = arith.subf %65, %57 : vector<1x128xf32>
    %67 = math.atan2 %66, %56 : vector<1x128xf32>
    %68 = vector.broadcast %7 : f32 to vector<1x128xf32>
    %69 = arith.mulf %63, %68 : vector<1x128xf32>
    %70 = vector.broadcast %13 : f32 to vector<1x128xf32>
    %71 = arith.addf %69, %70 : vector<1x128xf32>
    %cst_17 = arith.constant 0.000000e+00 : f32
    %72 = vector.broadcast %cst_17 : f32 to vector<1x128xf32>
    %73 = arith.maximumf %71, %72 : vector<1x128xf32>
    %74 = vector.broadcast %19 : f32 to vector<1x128xf32>
    %75 = arith.mulf %73, %74 : vector<1x128xf32>
    %76 = vector.broadcast %8 : f32 to vector<1x128xf32>
    %77 = arith.mulf %63, %76 : vector<1x128xf32>
    %78 = vector.broadcast %14 : f32 to vector<1x128xf32>
    %79 = arith.addf %77, %78 : vector<1x128xf32>
    %cst_18 = arith.constant 0.000000e+00 : f32
    %80 = vector.broadcast %cst_18 : f32 to vector<1x128xf32>
    %81 = arith.maximumf %79, %80 : vector<1x128xf32>
    %82 = vector.broadcast %20 : f32 to vector<1x128xf32>
    %83 = arith.mulf %81, %82 : vector<1x128xf32>
    %84 = arith.addf %75, %83 : vector<1x128xf32>
    %85 = vector.broadcast %9 : f32 to vector<1x128xf32>
    %86 = arith.mulf %63, %85 : vector<1x128xf32>
    %87 = vector.broadcast %15 : f32 to vector<1x128xf32>
    %88 = arith.addf %86, %87 : vector<1x128xf32>
    %cst_19 = arith.constant 0.000000e+00 : f32
    %89 = vector.broadcast %cst_19 : f32 to vector<1x128xf32>
    %90 = arith.maximumf %88, %89 : vector<1x128xf32>
    %91 = vector.broadcast %21 : f32 to vector<1x128xf32>
    %92 = arith.mulf %90, %91 : vector<1x128xf32>
    %93 = arith.addf %84, %92 : vector<1x128xf32>
    %94 = vector.broadcast %10 : f32 to vector<1x128xf32>
    %95 = arith.mulf %63, %94 : vector<1x128xf32>
    %96 = vector.broadcast %16 : f32 to vector<1x128xf32>
    %97 = arith.addf %95, %96 : vector<1x128xf32>
    %cst_20 = arith.constant 0.000000e+00 : f32
    %98 = vector.broadcast %cst_20 : f32 to vector<1x128xf32>
    %99 = arith.maximumf %97, %98 : vector<1x128xf32>
    %100 = vector.broadcast %22 : f32 to vector<1x128xf32>
    %101 = arith.mulf %99, %100 : vector<1x128xf32>
    %102 = arith.addf %93, %101 : vector<1x128xf32>
    %103 = vector.broadcast %11 : f32 to vector<1x128xf32>
    %104 = arith.mulf %63, %103 : vector<1x128xf32>
    %105 = vector.broadcast %17 : f32 to vector<1x128xf32>
    %106 = arith.addf %104, %105 : vector<1x128xf32>
    %cst_21 = arith.constant 0.000000e+00 : f32
    %107 = vector.broadcast %cst_21 : f32 to vector<1x128xf32>
    %108 = arith.maximumf %106, %107 : vector<1x128xf32>
    %109 = vector.broadcast %23 : f32 to vector<1x128xf32>
    %110 = arith.mulf %108, %109 : vector<1x128xf32>
    %111 = arith.addf %102, %110 : vector<1x128xf32>
    %112 = vector.broadcast %12 : f32 to vector<1x128xf32>
    %113 = arith.mulf %63, %112 : vector<1x128xf32>
    %114 = vector.broadcast %18 : f32 to vector<1x128xf32>
    %115 = arith.addf %113, %114 : vector<1x128xf32>
    %cst_22 = arith.constant 0.000000e+00 : f32
    %116 = vector.broadcast %cst_22 : f32 to vector<1x128xf32>
    %117 = arith.maximumf %115, %116 : vector<1x128xf32>
    %118 = vector.broadcast %24 : f32 to vector<1x128xf32>
    %119 = arith.mulf %117, %118 : vector<1x128xf32>
    %120 = arith.addf %111, %119 : vector<1x128xf32>
    %121 = vector.broadcast %25 : f32 to vector<1x128xf32>
    %122 = arith.addf %120, %121 : vector<1x128xf32>
    %123 = vector.broadcast %26 : f32 to vector<1x128xf32>
    %124 = arith.mulf %67, %123 : vector<1x128xf32>
    %125 = vector.broadcast %32 : f32 to vector<1x128xf32>
    %126 = arith.addf %124, %125 : vector<1x128xf32>
    %cst_23 = arith.constant 0.000000e+00 : f32
    %127 = vector.broadcast %cst_23 : f32 to vector<1x128xf32>
    %128 = arith.maximumf %126, %127 : vector<1x128xf32>
    %129 = vector.broadcast %38 : f32 to vector<1x128xf32>
    %130 = arith.mulf %128, %129 : vector<1x128xf32>
    %131 = vector.broadcast %27 : f32 to vector<1x128xf32>
    %132 = arith.mulf %67, %131 : vector<1x128xf32>
    %133 = vector.broadcast %33 : f32 to vector<1x128xf32>
    %134 = arith.addf %132, %133 : vector<1x128xf32>
    %cst_24 = arith.constant 0.000000e+00 : f32
    %135 = vector.broadcast %cst_24 : f32 to vector<1x128xf32>
    %136 = arith.maximumf %134, %135 : vector<1x128xf32>
    %137 = vector.broadcast %39 : f32 to vector<1x128xf32>
    %138 = arith.mulf %136, %137 : vector<1x128xf32>
    %139 = arith.addf %130, %138 : vector<1x128xf32>
    %140 = vector.broadcast %28 : f32 to vector<1x128xf32>
    %141 = arith.mulf %67, %140 : vector<1x128xf32>
    %142 = vector.broadcast %34 : f32 to vector<1x128xf32>
    %143 = arith.addf %141, %142 : vector<1x128xf32>
    %cst_25 = arith.constant 0.000000e+00 : f32
    %144 = vector.broadcast %cst_25 : f32 to vector<1x128xf32>
    %145 = arith.maximumf %143, %144 : vector<1x128xf32>
    %146 = vector.broadcast %40 : f32 to vector<1x128xf32>
    %147 = arith.mulf %145, %146 : vector<1x128xf32>
    %148 = arith.addf %139, %147 : vector<1x128xf32>
    %149 = vector.broadcast %29 : f32 to vector<1x128xf32>
    %150 = arith.mulf %67, %149 : vector<1x128xf32>
    %151 = vector.broadcast %35 : f32 to vector<1x128xf32>
    %152 = arith.addf %150, %151 : vector<1x128xf32>
    %cst_26 = arith.constant 0.000000e+00 : f32
    %153 = vector.broadcast %cst_26 : f32 to vector<1x128xf32>
    %154 = arith.maximumf %152, %153 : vector<1x128xf32>
    %155 = vector.broadcast %41 : f32 to vector<1x128xf32>
    %156 = arith.mulf %154, %155 : vector<1x128xf32>
    %157 = arith.addf %148, %156 : vector<1x128xf32>
    %158 = vector.broadcast %30 : f32 to vector<1x128xf32>
    %159 = arith.mulf %67, %158 : vector<1x128xf32>
    %160 = vector.broadcast %36 : f32 to vector<1x128xf32>
    %161 = arith.addf %159, %160 : vector<1x128xf32>
    %cst_27 = arith.constant 0.000000e+00 : f32
    %162 = vector.broadcast %cst_27 : f32 to vector<1x128xf32>
    %163 = arith.maximumf %161, %162 : vector<1x128xf32>
    %164 = vector.broadcast %42 : f32 to vector<1x128xf32>
    %165 = arith.mulf %163, %164 : vector<1x128xf32>
    %166 = arith.addf %157, %165 : vector<1x128xf32>
    %167 = vector.broadcast %31 : f32 to vector<1x128xf32>
    %168 = arith.mulf %67, %167 : vector<1x128xf32>
    %169 = vector.broadcast %37 : f32 to vector<1x128xf32>
    %170 = arith.addf %168, %169 : vector<1x128xf32>
    %cst_28 = arith.constant 0.000000e+00 : f32
    %171 = vector.broadcast %cst_28 : f32 to vector<1x128xf32>
    %172 = arith.maximumf %170, %171 : vector<1x128xf32>
    %173 = vector.broadcast %43 : f32 to vector<1x128xf32>
    %174 = arith.mulf %172, %173 : vector<1x128xf32>
    %175 = arith.addf %166, %174 : vector<1x128xf32>
    %176 = vector.broadcast %44 : f32 to vector<1x128xf32>
    %177 = arith.addf %175, %176 : vector<1x128xf32>
    %178 = arith.mulf %56, %56 : vector<1x128xf32>
    %179 = vector.broadcast %5 : f32 to vector<1x128xf32>
    %180 = arith.mulf %178, %179 : vector<1x128xf32>
    %181 = vector.broadcast %6 : f32 to vector<1x128xf32>
    %182 = arith.addf %180, %181 : vector<1x128xf32>
    %183 = arith.addf %182, %50 : vector<1x128xf32>
    %184 = arith.mulf %56, %52 : vector<1x128xf32>
    %185 = arith.subf %183, %184 : vector<1x128xf32>
    %186 = arith.mulf %122, %45 : vector<1x128xf32>
    %187 = arith.subf %185, %186 : vector<1x128xf32>
    %cst_29 = arith.constant 0.243902445 : f32
    %188 = vector.broadcast %cst_29 : f32 to vector<1x128xf32>
    %189 = arith.mulf %187, %188 : vector<1x128xf32>
    %190 = arith.addf %53, %189 : vector<1x128xf32>
    %191 = arith.mulf %57, %58 : vector<1x128xf32>
    %cst_30 = arith.constant 0.00999999977 : f32
    %192 = vector.broadcast %cst_30 : f32 to vector<1x128xf32>
    %193 = arith.mulf %191, %192 : vector<1x128xf32>
    %194 = arith.addf %190, %193 : vector<1x128xf32>
    %195 = arith.mulf %122, %46 : vector<1x128xf32>
    %196 = arith.addf %177, %195 : vector<1x128xf32>
    %cst_31 = arith.constant 0.243902445 : f32
    %197 = vector.broadcast %cst_31 : f32 to vector<1x128xf32>
    %198 = arith.mulf %196, %197 : vector<1x128xf32>
    %199 = arith.addf %54, %198 : vector<1x128xf32>
    %200 = arith.mulf %56, %58 : vector<1x128xf32>
    %cst_32 = arith.constant 0.00999999977 : f32
    %201 = vector.broadcast %cst_32 : f32 to vector<1x128xf32>
    %202 = arith.mulf %200, %201 : vector<1x128xf32>
    %203 = arith.subf %199, %202 : vector<1x128xf32>
    %204 = arith.mulf %122, %48 : vector<1x128xf32>
    %cst_33 = arith.constant 3.300000e-02 : f32
    %205 = vector.broadcast %cst_33 : f32 to vector<1x128xf32>
    %206 = arith.mulf %177, %205 : vector<1x128xf32>
    %207 = arith.subf %204, %206 : vector<1x128xf32>
    %cst_34 = arith.constant 359.712219 : f32
    %208 = vector.broadcast %cst_34 : f32 to vector<1x128xf32>
    %209 = arith.mulf %207, %208 : vector<1x128xf32>
    %210 = arith.addf %55, %209 : vector<1x128xf32>
    %211 = arith.addf %2, %194 : vector<1x128xf32>
    %212 = arith.addf %3, %203 : vector<1x128xf32>
    %213 = arith.addf %4, %210 : vector<1x128xf32>
    %cst_35 = arith.constant 2.900000e-02 : f32
    %214 = vector.broadcast %cst_35 : f32 to vector<1x128xf32>
    %215 = arith.mulf %213, %214 : vector<1x128xf32>
    %216 = arith.addf %215, %212 : vector<1x128xf32>
    %217 = math.atan2 %216, %211 : vector<1x128xf32>
    %218 = arith.subf %1, %217 : vector<1x128xf32>
    %cst_36 = arith.constant 3.300000e-02 : f32
    %219 = vector.broadcast %cst_36 : f32 to vector<1x128xf32>
    %220 = arith.mulf %213, %219 : vector<1x128xf32>
    %221 = arith.subf %220, %212 : vector<1x128xf32>
    %222 = math.atan2 %221, %211 : vector<1x128xf32>
    %223 = vector.broadcast %7 : f32 to vector<1x128xf32>
    %224 = arith.mulf %218, %223 : vector<1x128xf32>
    %225 = vector.broadcast %13 : f32 to vector<1x128xf32>
    %226 = arith.addf %224, %225 : vector<1x128xf32>
    %cst_37 = arith.constant 0.000000e+00 : f32
    %227 = vector.broadcast %cst_37 : f32 to vector<1x128xf32>
    %228 = arith.maximumf %226, %227 : vector<1x128xf32>
    %229 = vector.broadcast %19 : f32 to vector<1x128xf32>
    %230 = arith.mulf %228, %229 : vector<1x128xf32>
    %231 = vector.broadcast %8 : f32 to vector<1x128xf32>
    %232 = arith.mulf %218, %231 : vector<1x128xf32>
    %233 = vector.broadcast %14 : f32 to vector<1x128xf32>
    %234 = arith.addf %232, %233 : vector<1x128xf32>
    %cst_38 = arith.constant 0.000000e+00 : f32
    %235 = vector.broadcast %cst_38 : f32 to vector<1x128xf32>
    %236 = arith.maximumf %234, %235 : vector<1x128xf32>
    %237 = vector.broadcast %20 : f32 to vector<1x128xf32>
    %238 = arith.mulf %236, %237 : vector<1x128xf32>
    %239 = arith.addf %230, %238 : vector<1x128xf32>
    %240 = vector.broadcast %9 : f32 to vector<1x128xf32>
    %241 = arith.mulf %218, %240 : vector<1x128xf32>
    %242 = vector.broadcast %15 : f32 to vector<1x128xf32>
    %243 = arith.addf %241, %242 : vector<1x128xf32>
    %cst_39 = arith.constant 0.000000e+00 : f32
    %244 = vector.broadcast %cst_39 : f32 to vector<1x128xf32>
    %245 = arith.maximumf %243, %244 : vector<1x128xf32>
    %246 = vector.broadcast %21 : f32 to vector<1x128xf32>
    %247 = arith.mulf %245, %246 : vector<1x128xf32>
    %248 = arith.addf %239, %247 : vector<1x128xf32>
    %249 = vector.broadcast %10 : f32 to vector<1x128xf32>
    %250 = arith.mulf %218, %249 : vector<1x128xf32>
    %251 = vector.broadcast %16 : f32 to vector<1x128xf32>
    %252 = arith.addf %250, %251 : vector<1x128xf32>
    %cst_40 = arith.constant 0.000000e+00 : f32
    %253 = vector.broadcast %cst_40 : f32 to vector<1x128xf32>
    %254 = arith.maximumf %252, %253 : vector<1x128xf32>
    %255 = vector.broadcast %22 : f32 to vector<1x128xf32>
    %256 = arith.mulf %254, %255 : vector<1x128xf32>
    %257 = arith.addf %248, %256 : vector<1x128xf32>
    %258 = vector.broadcast %11 : f32 to vector<1x128xf32>
    %259 = arith.mulf %218, %258 : vector<1x128xf32>
    %260 = vector.broadcast %17 : f32 to vector<1x128xf32>
    %261 = arith.addf %259, %260 : vector<1x128xf32>
    %cst_41 = arith.constant 0.000000e+00 : f32
    %262 = vector.broadcast %cst_41 : f32 to vector<1x128xf32>
    %263 = arith.maximumf %261, %262 : vector<1x128xf32>
    %264 = vector.broadcast %23 : f32 to vector<1x128xf32>
    %265 = arith.mulf %263, %264 : vector<1x128xf32>
    %266 = arith.addf %257, %265 : vector<1x128xf32>
    %267 = vector.broadcast %12 : f32 to vector<1x128xf32>
    %268 = arith.mulf %218, %267 : vector<1x128xf32>
    %269 = vector.broadcast %18 : f32 to vector<1x128xf32>
    %270 = arith.addf %268, %269 : vector<1x128xf32>
    %cst_42 = arith.constant 0.000000e+00 : f32
    %271 = vector.broadcast %cst_42 : f32 to vector<1x128xf32>
    %272 = arith.maximumf %270, %271 : vector<1x128xf32>
    %273 = vector.broadcast %24 : f32 to vector<1x128xf32>
    %274 = arith.mulf %272, %273 : vector<1x128xf32>
    %275 = arith.addf %266, %274 : vector<1x128xf32>
    %276 = vector.broadcast %25 : f32 to vector<1x128xf32>
    %277 = arith.addf %275, %276 : vector<1x128xf32>
    %278 = vector.broadcast %26 : f32 to vector<1x128xf32>
    %279 = arith.mulf %222, %278 : vector<1x128xf32>
    %280 = vector.broadcast %32 : f32 to vector<1x128xf32>
    %281 = arith.addf %279, %280 : vector<1x128xf32>
    %cst_43 = arith.constant 0.000000e+00 : f32
    %282 = vector.broadcast %cst_43 : f32 to vector<1x128xf32>
    %283 = arith.maximumf %281, %282 : vector<1x128xf32>
    %284 = vector.broadcast %38 : f32 to vector<1x128xf32>
    %285 = arith.mulf %283, %284 : vector<1x128xf32>
    %286 = vector.broadcast %27 : f32 to vector<1x128xf32>
    %287 = arith.mulf %222, %286 : vector<1x128xf32>
    %288 = vector.broadcast %33 : f32 to vector<1x128xf32>
    %289 = arith.addf %287, %288 : vector<1x128xf32>
    %cst_44 = arith.constant 0.000000e+00 : f32
    %290 = vector.broadcast %cst_44 : f32 to vector<1x128xf32>
    %291 = arith.maximumf %289, %290 : vector<1x128xf32>
    %292 = vector.broadcast %39 : f32 to vector<1x128xf32>
    %293 = arith.mulf %291, %292 : vector<1x128xf32>
    %294 = arith.addf %285, %293 : vector<1x128xf32>
    %295 = vector.broadcast %28 : f32 to vector<1x128xf32>
    %296 = arith.mulf %222, %295 : vector<1x128xf32>
    %297 = vector.broadcast %34 : f32 to vector<1x128xf32>
    %298 = arith.addf %296, %297 : vector<1x128xf32>
    %cst_45 = arith.constant 0.000000e+00 : f32
    %299 = vector.broadcast %cst_45 : f32 to vector<1x128xf32>
    %300 = arith.maximumf %298, %299 : vector<1x128xf32>
    %301 = vector.broadcast %40 : f32 to vector<1x128xf32>
    %302 = arith.mulf %300, %301 : vector<1x128xf32>
    %303 = arith.addf %294, %302 : vector<1x128xf32>
    %304 = vector.broadcast %29 : f32 to vector<1x128xf32>
    %305 = arith.mulf %222, %304 : vector<1x128xf32>
    %306 = vector.broadcast %35 : f32 to vector<1x128xf32>
    %307 = arith.addf %305, %306 : vector<1x128xf32>
    %cst_46 = arith.constant 0.000000e+00 : f32
    %308 = vector.broadcast %cst_46 : f32 to vector<1x128xf32>
    %309 = arith.maximumf %307, %308 : vector<1x128xf32>
    %310 = vector.broadcast %41 : f32 to vector<1x128xf32>
    %311 = arith.mulf %309, %310 : vector<1x128xf32>
    %312 = arith.addf %303, %311 : vector<1x128xf32>
    %313 = vector.broadcast %30 : f32 to vector<1x128xf32>
    %314 = arith.mulf %222, %313 : vector<1x128xf32>
    %315 = vector.broadcast %36 : f32 to vector<1x128xf32>
    %316 = arith.addf %314, %315 : vector<1x128xf32>
    %cst_47 = arith.constant 0.000000e+00 : f32
    %317 = vector.broadcast %cst_47 : f32 to vector<1x128xf32>
    %318 = arith.maximumf %316, %317 : vector<1x128xf32>
    %319 = vector.broadcast %42 : f32 to vector<1x128xf32>
    %320 = arith.mulf %318, %319 : vector<1x128xf32>
    %321 = arith.addf %312, %320 : vector<1x128xf32>
    %322 = vector.broadcast %31 : f32 to vector<1x128xf32>
    %323 = arith.mulf %222, %322 : vector<1x128xf32>
    %324 = vector.broadcast %37 : f32 to vector<1x128xf32>
    %325 = arith.addf %323, %324 : vector<1x128xf32>
    %cst_48 = arith.constant 0.000000e+00 : f32
    %326 = vector.broadcast %cst_48 : f32 to vector<1x128xf32>
    %327 = arith.maximumf %325, %326 : vector<1x128xf32>
    %328 = vector.broadcast %43 : f32 to vector<1x128xf32>
    %329 = arith.mulf %327, %328 : vector<1x128xf32>
    %330 = arith.addf %321, %329 : vector<1x128xf32>
    %331 = vector.broadcast %44 : f32 to vector<1x128xf32>
    %332 = arith.addf %330, %331 : vector<1x128xf32>
    %333 = arith.mulf %211, %211 : vector<1x128xf32>
    %334 = vector.broadcast %5 : f32 to vector<1x128xf32>
    %335 = arith.mulf %333, %334 : vector<1x128xf32>
    %336 = vector.broadcast %6 : f32 to vector<1x128xf32>
    %337 = arith.addf %335, %336 : vector<1x128xf32>
    %338 = arith.addf %337, %50 : vector<1x128xf32>
    %339 = arith.mulf %211, %52 : vector<1x128xf32>
    %340 = arith.subf %338, %339 : vector<1x128xf32>
    %341 = arith.mulf %277, %45 : vector<1x128xf32>
    %342 = arith.subf %340, %341 : vector<1x128xf32>
    %cst_49 = arith.constant 0.243902445 : f32
    %343 = vector.broadcast %cst_49 : f32 to vector<1x128xf32>
    %344 = arith.mulf %342, %343 : vector<1x128xf32>
    %345 = arith.addf %194, %344 : vector<1x128xf32>
    %346 = arith.mulf %212, %213 : vector<1x128xf32>
    %cst_50 = arith.constant 0.00999999977 : f32
    %347 = vector.broadcast %cst_50 : f32 to vector<1x128xf32>
    %348 = arith.mulf %346, %347 : vector<1x128xf32>
    %349 = arith.addf %345, %348 : vector<1x128xf32>
    %350 = arith.mulf %277, %46 : vector<1x128xf32>
    %351 = arith.addf %332, %350 : vector<1x128xf32>
    %cst_51 = arith.constant 0.243902445 : f32
    %352 = vector.broadcast %cst_51 : f32 to vector<1x128xf32>
    %353 = arith.mulf %351, %352 : vector<1x128xf32>
    %354 = arith.addf %203, %353 : vector<1x128xf32>
    %355 = arith.mulf %211, %213 : vector<1x128xf32>
    %cst_52 = arith.constant 0.00999999977 : f32
    %356 = vector.broadcast %cst_52 : f32 to vector<1x128xf32>
    %357 = arith.mulf %355, %356 : vector<1x128xf32>
    %358 = arith.subf %354, %357 : vector<1x128xf32>
    %359 = arith.mulf %277, %48 : vector<1x128xf32>
    %cst_53 = arith.constant 3.300000e-02 : f32
    %360 = vector.broadcast %cst_53 : f32 to vector<1x128xf32>
    %361 = arith.mulf %332, %360 : vector<1x128xf32>
    %362 = arith.subf %359, %361 : vector<1x128xf32>
    %cst_54 = arith.constant 359.712219 : f32
    %363 = vector.broadcast %cst_54 : f32 to vector<1x128xf32>
    %364 = arith.mulf %362, %363 : vector<1x128xf32>
    %365 = arith.addf %210, %364 : vector<1x128xf32>
    %c0_55 = arith.constant 0 : index
    %c0_56 = arith.constant 0 : index
    %366 = vector.load %arg2[%c0_55, %c0_56] : memref<3x128xf32, #tpu.memory_space<vmem>>, vector<1x128xf32>
    tpu.vector_store %arg2[%c0_55, %c0_56], %349 {strides = array<i32>} : memref<3x128xf32, #tpu.memory_space<vmem>>, vector<1x128xf32>,
    %c1_57 = arith.constant 1 : index
    %c0_58 = arith.constant 0 : index
    %367 = vector.load %arg2[%c1_57, %c0_58] : memref<3x128xf32, #tpu.memory_space<vmem>>, vector<1x128xf32>
    tpu.vector_store %arg2[%c1_57, %c0_58], %358 {strides = array<i32>} : memref<3x128xf32, #tpu.memory_space<vmem>>, vector<1x128xf32>,
    %c2_59 = arith.constant 2 : index
    %c0_60 = arith.constant 0 : index
    %368 = vector.load %arg2[%c2_59, %c0_60] : memref<3x128xf32, #tpu.memory_space<vmem>>, vector<1x128xf32>
    tpu.vector_store %arg2[%c2_59, %c0_60], %365 {strides = array<i32>} : memref<3x128xf32, #tpu.memory_space<vmem>>, vector<1x128xf32>,
    return
  }
}

</mosaic_0001>

<bundles_post_ra>
// kernel: tpu_custom_call.1
= control target key start
LH: loop header
LB: loop body
LE: loop exit
PB: predicated region body
PF: predicated region fallthrough
CT: control target
= control target key end

     0   :  { %s1517_s0 = inlined_call_operand.hbm [shape: f32[6,128], index: 0, kind: input, shape index: {}]   ;;  %s1518_s1 = inlined_call_operand.vmem [shape: f32[40], index: 1, kind: input, shape index: {}]   ;;  %s1519_s2 = inlined_call_operand.hbm [shape: f32[3,128], index: 2, kind: output, shape index: {}]  }
   0x1   :  { %1563 = sst [smem:[#allocation25_spill]] %s1519_s2 }
   0x2   :  { %7 = vsyncpa [#allocation3], 0 }
   0x3   :  { %8 = vsyncpa [#allocation5], 0 }
   0x4   :  { %9 = vsyncpa [#allocation4], 0  ;;  %s26_s11 = sshll.u32 %s1518_s1, 4  ;;  %s861_s12 = smov [#allocation2]   ;;  %s27_s11 = int_to_ptr.vmem [resolvable:$true] %s26_s11 }
   0x5   :  { %s16_s13 = sshll.u32 %s861_s12, 4  ;;  %s799_s16 = scalar_lea.hbm %s1517_s0, 128  ;;  %s17_s13 = int_to_ptr.vmem [resolvable:$true] %s16_s13 }
   0x6   :  { %p800_p0 = scmp.ne.s32.totalorder %s1517_s0, %s799_s16  ;;  %p803_p1 = scmp.lt.u32.totalorder %s799_s16, %s1517_s0 }
   0x8   :  { %p805_p2 = pnand %p803_p1, %p800_p0 }
   0xa   :  { %808 = shalt.err (!%p805_p2)
}
   0xb   :  { %s809_s21 = scalar_lea.vmem %s17_s13, 128  ;;  %p814_p4 = scmp.lt.s32.totalorder %s17_s13, %s17_s13 }
   0xc   :  { %p810_p3 = scmp.ne.s32.totalorder %s17_s13, %s809_s21  ;;  %p815_p5 = scmp.lt.s32.totalorder %s809_s21, %s809_s21 }
   0xe   :  { %p816_p6 = por %p815_p5, %p814_p4 }
  0x10   :  { %p817_p7 = pnand %p816_p6, %p810_p3 }
  0x12   :  { %820 = shalt.err (!%p817_p7)
}
  0x13   :  { %19 = dma.hbm_to_vmem [thread:$0]  %s1517_s0, 128, %s17_s13, [#allocation3]  }
  0x14   :  { %s821_s23 = scalar_lea.vmem %s27_s11, 16  ;;  %p826_p9 = scmp.lt.s32.totalorder %s27_s11, %s27_s11 }
  0x15   :  { %p822_p8 = scmp.ne.s32.totalorder %s27_s11, %s821_s23  ;;  %p827_p10 = scmp.lt.s32.totalorder %s821_s23, %s821_s23 }
  0x17   :  { %p828_p11 = por %p827_p10, %p826_p9 }
  0x19   :  { %p829_p12 = pnand %p828_p11, %p822_p8 }
  0x1b   :  { %832 = shalt.err (!%p829_p12)
}
  0x1c   :  { %s862_s24 = smov [#allocation6]  }
  0x1d   :  { %29 = dma.vmem_to_smem %s27_s11, 16, %s862_s24, [#allocation5]  }
  0x1e   :  { %855 = dma.done.wait [#allocation3], 128  }
  0x1f   :  { %856 = vsyncadd [#allocation3], 4294967168 }
  0x20   :  { %857 = dma.done.wait [#allocation5], 16  }
  0x21   :  { %858 = vsyncadd [#allocation5], 4294967280 }
  0x22   :  { %36 = sfence }
  0x23   :  { %v902_v0 = vld [vmem:[#allocation2 + $0x2] sm:$0x1]  ;;  %v863_v11 = vmov 683565275   ;;  %v864_v13 = vmov 2475754826  }
  0x24   :  { %v85_v1 = vand.u32 2139095040, %v902_v0  ;;  %v82_v5 = vand.u32 2147483647, %v902_v0  ;;  %v865_v16 = vmov 2131351028   ;;  %s977_s0 = sld [smem:[#allocation6]] }
  0x25   :  { %v866_v20 = vmov 2102212464   ;;  %v867_v27 = vmov 920167782   ;;  %v908_v30 = vld [vmem:[#allocation2 + $0x5] sm:$0x1] }
  0x26   :  { %v86_v2 = vshrl.u32 %v85_v1, 23  ;;  %v89_v8 = vand.u32 8388607, %v82_v5  ;;  %v868_v31 = vmov 1326507024   ;;  %s981_s25 = sld [smem:[#allocation6 + $0x1]] }
  0x27   :  { %v911_v36 = vld [vmem:[#allocation2 + $0x3] sm:$0x1]  ;;  %v913_v37 = vld [vmem:[#allocation2 + $0x4] sm:$0x1]  ;;  %v295_v44 = vmul.f32 0.029, %v908_v30 }
  0x28   :  { %v764_v3 = vadd.s32 4294967169, %v86_v2  ;;  %v90_v19 = vor.u32 8388608, %v89_v8  ;;  %v928_v50 = vand.u32 2147483647, %v911_v36  ;;  %v345_v61 = vmul.f32 0.033, %v908_v30 }
  0x29   :  { %v925_v49 = vadd.f32 %v295_v44, %v913_v37  ;;  %s983_s26 = sld [smem:[#allocation6 + $0x2]]  ;;  %s985_s27 = sld [smem:[#allocation6 + $0x3]]  ;;  %vm84_vm7 = vcmp.lt.s32.totalorder %v902_v0, 0  ;;  %vm1020_vm8 = vcmp.le.f32.partialorder %v82_v5, 0.7853982  ;;  %vm327_vm9 = vcmp.lt.s32.totalorder %v911_v36, 0 }
  0x2a   :  { %v92_v4 = vadd.s32 1, %v764_v3  ;;  %v130_v35 = vshll.u32 %v90_v19, 8  ;;  %v946_v63 = vsub.f32 %v345_v61, %v913_v37  ;;  %1564 = sst [smem:[#allocation11_spill]] %s977_s0  ;;  %s987_s28 = sld [smem:[#allocation6 + $0x4]]  ;;  %vm324_vm10 = vcmp.lt.f32.partialorder %v911_v36, 0.0 }
  0x2b   :  { %v937_v57 = vand.u32 2147483647, %v925_v49  ;;  %s989_s29 = sld [smem:[#allocation6 + $0x5]]  ;;  %s992_s30 = sld [smem:[#allocation6 + $0x6]]  ;;  %vm331_vm11 = vcmp.ne.f32.partialorder %v911_v36, %v911_v36  ;;  %vm329_vm13 = vcmp.eq.f32.partialorder %v925_v49, 0.0  ;;  %vm332_vm14 = vcmp.ne.f32.partialorder %v925_v49, %v925_v49 }
  0x2c   :  { %vm93_vm0 = vcmp.gt.s32.totalorder %v92_v4, 0  ;;  %v949_v2 = vand.u32 2147483647, %v946_v63  ;;  %1565 = sst [smem:[#allocation12_spill]] %s981_s25  ;;  %s994_s3 = sld [smem:[#allocation6 + $0x7]]  ;;  %vm337_vm15 = vcmp.eq.s32.totalorder %v928_v50, inf }
  0x2d   :  { %v94_v6 = vsel %vm93_vm0, %v92_v4, 0  ;;  %v300_v59 = vmax.f32 %v928_v50, %v937_v57  ;;  %s997_s4 = sld [smem:[#allocation6 + $0x8]]  ;;  %s999_s5 = sld [smem:[#allocation6 + $0x9]]  ;;  %vm321_vm12 = vcmp.gt.f32.partialorder %v937_v57, %v928_v50  ;;  %vm338_vm0 = vcmp.eq.s32.totalorder %v937_v57, inf }
  0x2e   :  { %v96_v7 = vand.u32 31, %v94_v6  ;;  %v95_v9 = vshrl.u32 %v94_v6, 5  ;;  %v350_v4 = vmax.f32 %v928_v50, %v949_v2  ;;  %s1001_s6 = sld [smem:[#allocation6 + $0xa]]  ;;  %s1003_s7 = sld [smem:[#allocation6 + $0xb]] }
  0x2f   :  { %787 = vrcp.f32 %v300_v59  ;;  %s1007_s8 = sld [smem:[#allocation6 + $0xc]]  ;;  %s1009_s9 = sld [smem:[#allocation6 + $0xd]] }
  0x30   :  { %v97_v10 = vsub.s32 32, %v96_v7  ;;  %v99_v12 = vshll.u32 %v863_v11, %v96_v7  ;;  %v102_v14 = vshll.u32 %v864_v13, %v96_v7  ;;  %v105_v18 = vshll.u32 %v865_v16, %v96_v7  ;;  %s1014_s10 = sld [smem:[#allocation6 + $0xe]]  ;;  %s1016_s11 = sld [smem:[#allocation6 + $0xf]] }
  0x31   :  { %v108_v22 = vshll.u32 %v866_v20, %v96_v7  ;;  %vm114_vm1 = vcmp.lt.s32.totalorder %v95_v9, 1  ;;  %v111_v29 = vshll.u32 %v867_v27, %v96_v7  ;;  %vm117_vm2 = vcmp.lt.s32.totalorder %v95_v9, 4  ;;  %s1025_s12 = sld [smem:[#allocation6 + $0x10]]  ;;  %s1027_s13 = sld [smem:[#allocation6 + $0x11]] }
  0x32   :  { %v100_v15 = vshrl.u32 %v864_v13, %v97_v10  ;;  %v103_v17 = vshrl.u32 %v865_v16, %v97_v10  ;;  %v106_v21 = vshrl.u32 %v866_v20, %v97_v10  ;;  %v98_v23 = vshrl.u32 %v863_v11, %v97_v10  ;;  %s1029_s14 = sld [smem:[#allocation6 + $0x12]]  ;;  %s1031_s15 = sld [smem:[#allocation6 + $0x13]] }
  0x33   :  { %v109_v28 = vshrl.u32 %v867_v27, %v97_v10  ;;  %v112_v32 = vshrl.u32 %v868_v31, %v97_v10  ;;  %vm116_vm3 = vcmp.lt.s32.totalorder %v95_v9, 3  ;;  %vm115_vm4 = vcmp.lt.s32.totalorder %v95_v9, 2  ;;  %1566 = sst [smem:[#allocation13_spill]] %s997_s4  ;;  %s1035_s16 = sld [smem:[#allocation6 + $0x15]] }
  0x34   :  { %v101_v24 = vor.u32 %v100_v15, %v99_v12  ;;  %v104_v25 = vor.u32 %v103_v17, %v102_v14  ;;  %v107_v26 = vor.u32 %v106_v21, %v105_v18  ;;  %v299_v7 = vmin.f32 %v928_v50, %v937_v57  ;;  %1567 = sst [smem:[#allocation14_spill]] %s1001_s6  ;;  %s1040_s17 = sld [smem:[#allocation6 + $0x16]] }
  0x35   :  { %v110_v33 = vor.u32 %v109_v28, %v108_v22  ;;  %v113_v38 = vor.u32 %v112_v32, %v111_v29  ;;  %789 = vrcp.f32 %v350_v4  ;;  %v349_v15 = vmin.f32 %v928_v50, %v949_v2  ;;  %1568 = sst [smem:[#allocation15_spill]] %s1003_s7  ;;  %s1042_s18 = sld [smem:[#allocation6 + $0x17]] }
  0x36   :  { %v119_v34 = vsel %vm117_vm2, %v107_v26, 2102212464  ;;  %v118_v39 = vsel %vm114_vm1, %v98_v23, %v101_v24  ;;  %v122_v40 = vsel %vm114_vm1, %v101_v24, %v104_v25  ;;  %v126_v43 = vsel %vm114_vm1, %v104_v25, %v107_v26  ;;  %1569 = sst [smem:[#allocation16_spill]] %s1007_s8  ;;  %s1063_s19 = sld [smem:[#allocation6 + $0x18]]  ;;  %vm1143_vm1 = vmor %vm331_vm11, %vm332_vm14 }
  0x37   :  { %v120_v41 = vsel %vm116_vm3, %v104_v25, %v119_v34  ;;  %v123_v42 = vsel %vm117_vm2, %v110_v33, 920167782  ;;  %v127_v46 = vsel %vm117_vm2, %v113_v38, 1326507024  ;;  %1570 = sst [smem:[#allocation17_spill]] %s1009_s9  ;;  %s1065_s20 = sld [smem:[#allocation6 + $0x19]]  ;;  %vm339_vm2 = vmand %vm337_vm15, %vm338_vm0 }
  0x38   :  { %v124_v45 = vsel %vm116_vm3, %v107_v26, %v123_v42  ;;  %v128_v48 = vsel %vm116_vm3, %v110_v33, %v127_v46  ;;  %v121_v51 = vsel %vm115_vm4, %v118_v39, %v120_v41  ;;  %1571 = sst [smem:[#allocation18_spill]] %s1014_s10  ;;  %s1072_s21 = sld [smem:[#allocation6 + $0x1b]]  ;;  %vm371_vm3 = vcmp.gt.f32.partialorder %v949_v2, %v928_v50 }
  0x39   :  { %v125_v47 = vsel %vm115_vm4, %v122_v40, %v124_v45  ;;  %v129_v52 = vsel %vm115_vm4, %v126_v43, %v128_v48  ;;  %v137_v58 = vmul.u32 %v130_v35, %v121_v51  ;;  %v788_v9 = vpop.eup %787  ;;  %1574 = sst [smem:[#allocation19_spill]] %s1027_s13  ;;  %s1074_s1 = sld [smem:[#allocation6 + $0x1c]]  ;;  %vm379_vm4 = vcmp.eq.f32.partialorder %v946_v63, 0.0 }
  0x3a   :  { %v930_v53 = vmul.u32.u64.low %v130_v35, %v125_v47  ;;  %v931_v54 = vmul.u32.u64.high %v130_v35, %v125_v47, %v930_v53  ;;  %v933_v55 = vmul.u32.u64.low %v130_v35, %v129_v52  ;;  %v934_v56 = vmul.u32.u64.high %v130_v35, %v129_v52, %v933_v55  ;;  %1575 = sst [smem:[#allocation20_spill]] %s1029_s14  ;;  %s1081_s23 = sld [smem:[#allocation6 + $0x22]] }
  0x3b   :  { %v958_v11 = vmul.f32 %v788_v9, %v299_v7  ;;  %1576 = sst [smem:[#allocation21_spill]] %s1031_s15  ;;  %v401_v9 = vstv %s985_s27  ;;  %s1079_s22 = sld [smem:[#allocation6 + $0x21]] }
  0x3c   :  { %v140_v60 = vadd.s32 1, %v931_v54  ;;  %vm139_vm5 = vc.u32 %v934_v56, %v930_v53  ;;  %v138_v23 = vadd.s32 %v930_v53, %v934_v56  ;;  %v1532_v56 = vstv %s977_s0  ;;  %1577 = sst [smem:[#allocation22_spill]] %s1042_s18  ;;  %s1087_s24 = sld [smem:[#allocation6 + $0x1a]] }
  0x3d   :  { %v962_v13 = vmul.f32 %v958_v11, %v958_v11  ;;  %s1089_s2 = sld [smem:[#allocation6 + $0x1d]]  ;;  %s1099_s0 = sld [smem:[#allocation6 + $0x23]] }
  0x3e   :  { %v141_v62 = vsel %vm139_vm5, %v140_v60, %v931_v54  ;;  %v492_v54 = vmul.f32 %v911_v36, %v911_v36  ;;  %vm382_vm5 = vcmp.ne.f32.partialorder %v946_v63, %v946_v63  ;;  %s1605_s27 = sld [smem:[#allocation20_spill]] }
  0x3f   :  { %v142_v1 = vadd.s32 %v141_v62, %v137_v58  ;;  %v304_v16 = vmul.f32 0.002785687, %v962_v13  ;;  %v790_v18 = vpop.eup %789 }
  0x40   :  { %v967_v21 = vmul.f32 %v790_v18, %v349_v15  ;;  %v494_v62 = vmul.f32 %v1532_v56, %v492_v54  ;;  %v1534_v15 = vstv %s992_s30  ;;  %v1535_v18 = vstv %s994_s3 }
  0x41   :  { %v143_v3 = vadd.s32 536870912, %v142_v1  ;;  %v305_v19 = vadd.f32 -0.015866, %v304_v16  ;;  %v869_v54 = vmov 0.0   ;;  %v448_v57 = vstv %s1079_s22 }
  0x42   :  { %v973_v24 = vmul.f32 %v967_v21, %v967_v21 }
  0x43   :  { %v953_v6 = vshrl.u32 %v143_v3, 30  ;;  %v306_v22 = vmul.f32 %v305_v19, %v962_v13  ;;  %v1531_v3 = vstv %s981_s25  ;;  %s1097_s25 = sld [smem:[#allocation6 + $0x1e]] }
  0x44   :  { %v354_v29 = vmul.f32 0.002785687, %v973_v24  ;;  %v1054_v19 = vadd.f32 %v1531_v3, %v494_v62 }
  0x45   :  { %v145_v8 = vshll.u32 %v953_v6, 30  ;;  %v307_v26 = vadd.f32 0.04247222, %v306_v22  ;;  %v403_v22 = vstv %s999_s5 }
  0x46   :  { %v355_v35 = vadd.f32 -0.015866, %v354_v29  ;;  %v399_v29 = vstv %s1014_s10  ;;  %s1589_s10 = sld [smem:[#allocation21_spill]] }
  0x47   :  { %v146_v10 = vsub.s32 %v142_v1, %v145_v8  ;;  %v308_v32 = vmul.f32 %v307_v26, %v962_v13  ;;  %v394_v8 = vstv %s983_s26  ;;  %v37_v26 = vld [vmem:[#allocation2] sm:$0x1] }
  0x48   :  { %v356_v40 = vmul.f32 %v355_v35, %v973_v24  ;;  %v435_v35 = vstv %s1009_s9  ;;  %s1287_s9 = sld [smem:[#allocation6 + $0x27]] }
  0x49   :  { %v148_v12 = vsub.s32 0, %v146_v10  ;;  %v309_v38 = vadd.f32 -0.074975304, %v308_v32 }
  0x4a   :  { %v357_v44 = vadd.f32 0.04247222, %v356_v40  ;;  %v1553_v40 = vstv %s1031_s15  ;;  %s1116_s15 = sld [smem:[#allocation6 + $0x1f]] }
  0x4b   :  { %v765_v14 = vmin.u32 %v148_v12, %v146_v10  ;;  %v310_v42 = vmul.f32 %v309_v38, %v962_v13  ;;  %v409_v12 = vstv %s987_s28  ;;  %s1606_s28 = sld [smem:[#allocation12_spill]] }
  0x4c   :  { %v358_v46 = vmul.f32 %v357_v44, %v973_v24  ;;  %v443_v44 = vstv %s1035_s16 }
  0x4d   :  { %v150_v17 = vclz %v765_v14  ;;  %v311_v45 = vadd.f32 0.1064488, %v310_v42  ;;  %v1536_v14 = vstv %s989_s29 }
  0x4e   :  { %v359_v52 = vadd.f32 -0.074975304, %v358_v46  ;;  %1590 = sst [smem:[#allocation21_spill]] %s1287_s9 }
  0x4f   :  { %v766_v20 = vadd.s32 4294967294, %v150_v17  ;;  %v312_v51 = vmul.f32 %v311_v45, %v962_v13  ;;  %v1538_v17 = vstv %s997_s4  ;;  %v1101_v45 = vmul.f32 0.287, %v37_v26  ;;  %s1584_s4 = sld [smem:[#allocation19_spill]] }
  0x50   :  { %v360_v55 = vmul.f32 %v359_v52, %v973_v24 }
  0x51   :  { %vm767_vm6 = vcmp.lt.s32.totalorder %v766_v20, 0  ;;  %v313_v53 = vadd.f32 -0.14207031, %v312_v51  ;;  %v1106_v51 = vmul.f32 0.0545, %v37_v26 }
  0x52   :  { %v153_v25 = vsel %vm767_vm6, 0, %v766_v20  ;;  %v361_v61 = vadd.f32 0.1064488, %v360_v55  ;;  %v1113_v55 = vsel %vm327_vm9, 3.1415927, %v869_v54  ;;  %vm388_vm6 = vcmp.eq.s32.totalorder %v949_v2, inf }
  0x53   :  { %v154_v27 = vsub.s32 32, %v153_v25  ;;  %v158_v28 = vsub.s32 4294967266, %v153_v25  ;;  %v155_v31 = vshll.u32 %v146_v10, %v153_v25  ;;  %v314_v60 = vmul.f32 %v313_v53, %v962_v13  ;;  %vm389_vm9 = vmand %vm337_vm15, %vm388_vm6 }
  0x54   :  { %v362_v1 = vmul.f32 %v361_v61, %v973_v24  ;;  %v419_v25 = vstv %s1003_s7  ;;  %v1533_v61 = vmov 0.7853982   ;;  %vm174_vm15 = vweird.f32 %v902_v0  ;;  %s1603_s7 = sld [smem:[#allocation11_spill]] }
  0x55   :  { %v156_v33 = vshrl.u32 %v138_v23, %v154_v27  ;;  %v159_v34 = vadd.s32 127, %v158_v28  ;;  %v315_v5 = vadd.f32 0.19993454, %v314_v60  ;;  %v411_v23 = vstv %s1001_s6  ;;  %s1253_s6 = sld [smem:[#allocation6 + $0x26]] }
  0x56   :  { %v363_v10 = vadd.f32 -0.14207031, %v362_v1  ;;  %v445_v1 = vstv %s1072_s21 }
  0x57   :  { %v160_v39 = vshll.u32 %v159_v34, 23  ;;  %v157_v41 = vor.u32 %v156_v33, %v155_v31  ;;  %v316_v7 = vmul.f32 %v315_v5, %v962_v13  ;;  %v427_v31 = vstv %s1007_s8  ;;  %s1251_s8 = sld [smem:[#allocation6 + $0x14]] }
  0x58   :  { %v364_v20 = vmul.f32 %v363_v10, %v973_v24  ;;  %v406_v33 = vstv %s1016_s11  ;;  %v1544_v34 = vstv %s1025_s12  ;;  %v336_v5 = vsel %vm324_vm10, 2.3561945, %v1533_v61 }
  0x59   :  { %v161_v43 = vor.u32 4788187, %v160_v39  ;;  %v164_v48 = vcvt.s32.f32 %v157_v41  ;;  %v317_v16 = vadd.f32 -0.33333147, %v316_v7  ;;  %v1546_v39 = vstv %s1029_s14  ;;  %s1118_s14 = sld [smem:[#allocation6 + $0x20]] }
  0x5a   :  { %v365_v32 = vadd.f32 0.19993454, %v364_v20  ;;  %v168_v41 = vsub.s32 4, %v953_v6  ;;  %v452_v10 = vstv %s1074_s1 }
  0x5b   :  { %v162_v47 = vand.u32 2147483647, %v161_v43  ;;  %v318_v28 = vmul.f32 %v317_v16, %v962_v13  ;;  %v1545_v13 = vstv %s1027_s13  ;;  %s1133_s13 = sld [smem:[#allocation6 + $0x25]]  ;;  %v455_v16 = vstv %s1081_s23  ;;  %1588 = sst [smem:[#allocation22_spill]] %s1253_s6 }
  0x5c   :  { %v366_v43 = vmul.f32 %v365_v32, %v973_v24  ;;  %v1552_v32 = vstv %s1099_s0 }
  0x5d   :  { %v165_v59 = vmul.f32 %v164_v48, %v162_v47  ;;  %v319_v38 = vmul.f32 %v318_v28, %v958_v11  ;;  %v450_v47 = vstv %s1040_s17  ;;  %v458_v48 = vstv %s1042_s18  ;;  %s1126_s18 = sld [smem:[#allocation6 + $0x24]]  ;;  %1587 = sst [smem:[#allocation19_spill]] %s1251_s8 }
  0x5e   :  { %v367_v52 = vadd.f32 -0.33333147, %v366_v43 }
  0x5f   :  { %v166_v4 = vxor.u32 2147483648, %v165_v59  ;;  %v320_v46 = vadd.f32 %v319_v38, %v958_v11  ;;  %v169_v11 = vsel %vm84_vm7, %v168_v41, %v953_v6  ;;  %v466_v38 = vstv %s1063_s19 }
  0x61   :  { %v167_v27 = vsel %vm84_vm7, %v166_v4, %v165_v59  ;;  %v322_v53 = vsub.f32 1.5707964, %v320_v46  ;;  %v368_v59 = vmul.f32 %v367_v52, %v973_v24  ;;  %1579 = sst [smem:[#allocation24_spill]] %s1133_s13  ;;  %v342_v24 = vand.u32 2147483648, %v925_v49  ;;  %vm1181_vm7 = vmor %vm331_vm11, %vm382_vm5 }
  0x62   :  { %v170_v42 = vsel %vm1020_vm8, %v902_v0, %v167_v27  ;;  %v171_v4 = vsel %vm1020_vm8, 0, %v169_v11  ;;  %v460_v27 = vstv %s1089_s2  ;;  %s1620_s2 = sld [smem:[#allocation19_spill]] }
  0x63   :  { %791 = vcosq.f32 %v170_v42  ;;  %1578 = sst [smem:[#allocation23_spill]] %s1126_s18  ;;  %v323_v60 = vsel %vm321_vm12, %v322_v53, %v320_v46  ;;  %v369_v62 = vmul.f32 %v368_v59, %v967_v21  ;;  %v175_v20 = vadd.s32 3, %v171_v4 }
  0x64   :  { %793 = vsinq.f32 %v170_v42  ;;  %v325_v6 = vsub.f32 3.1415927, %v323_v60  ;;  %v1167_v43 = vand.u32 3, %v171_v4  ;;  %v392_v46 = vand.u32 2147483648, %v946_v63 }
  0x65   :  { %v370_v58 = vadd.f32 %v369_v62, %v967_v21  ;;  %v468_v21 = vstv %s1097_s25  ;;  %v1172_v52 = vand.u32 3, %v175_v20  ;;  %v1557_v62 = vstv %s1065_s20  ;;  %s1623_s25 = sld [smem:[#allocation21_spill]] }
  0x66   :  { %v326_v26 = vsel %vm324_vm10, %v325_v6, %v323_v60  ;;  %v1551_v6 = vstv %s1126_s18  ;;  %v1555_v4 = vstv %s1116_s15  ;;  %v1550_v20 = vstv %s1133_s13 }
  0x67   :  { %v330_v28 = vsel %vm329_vm13, %v1113_v55, %v326_v26  ;;  %v372_v42 = vsub.f32 1.5707964, %v370_v58  ;;  %vm281_vm8 = vcmp.eq.s32.totalorder %v1167_v43, 0  ;;  %vm178_vm11 = vcmp.eq.s32.totalorder %v1172_v52, 0 }
  0x68   :  { %v334_v41 = vsel %vm1143_vm1, nan, %v330_v28  ;;  %vm284_vm12 = vcmp.eq.s32.totalorder %v1167_v43, 2  ;;  %vm177_vm13 = vcmp.lt.s32.totalorder %v1172_v52, 2  ;;  %vm280_vm14 = vcmp.lt.s32.totalorder %v1167_v43, 2 }
  0x69   :  { %v340_v49 = vsel %vm339_vm2, %v336_v5, %v334_v41  ;;  %v373_v11 = vsel %vm371_vm3, %v372_v42, %v370_v58  ;;  %v1556_v41 = vstv %s1087_s24  ;;  %v1554_v58 = vstv %s1118_s14 }
  0x6a   :  { %v341_v53 = vand.u32 2147483647, %v340_v49  ;;  %v375_v60 = vsub.f32 3.1415927, %v373_v11  ;;  %v1199_v42 = vmul.f32 %v1106_v51, %v911_v36 }
  0x6c   :  { %v343_v26 = vor.u32 %v342_v24, %v341_v53  ;;  %v376_v2 = vsel %vm324_vm10, %v375_v60, %v373_v11  ;;  %v1195_v24 = vadd.f32 %v1054_v19, %v1101_v45  ;;  %vm181_vm10 = vcmp.eq.s32.totalorder %v1172_v52, 2 }
  0x6d   :  { %v792_v59 = vpop.eup %791  ;;  %v380_v50 = vsel %vm379_vm4, %v1113_v55, %v376_v2 }
  0x6e   :  { %v794_v7 = vpop.eup %793  ;;  %v344_v49 = vsub.f32 %v902_v0, %v343_v26  ;;  %v182_v19 = vxor.u32 2147483648, %v792_v59  ;;  %v384_v11 = vsel %vm1181_vm7, nan, %v380_v50 }
  0x6f   :  { %v179_v53 = vxor.u32 2147483648, %v794_v7  ;;  %v390_v60 = vsel %vm389_vm9, %v336_v5, %v384_v11 }
  0x70   :  { %v395_v3 = vmul.f32 %v394_v8, %v344_v49  ;;  %v402_v26 = vmul.f32 %v401_v9, %v344_v49  ;;  %v410_v63 = vmul.f32 %v409_v12, %v344_v49  ;;  %v391_v55 = vand.u32 2147483647, %v390_v60 }
  0x71   :  { %v418_v2 = vmul.f32 %v1536_v14, %v344_v49  ;;  %v426_v56 = vmul.f32 %v1534_v15, %v344_v49  ;;  %v434_v61 = vmul.f32 %v1535_v18, %v344_v49  ;;  %v183_v28 = vsel %vm181_vm10, %v182_v19, %v794_v7 }
  0x72   :  { %v397_v5 = vadd.f32 %v1538_v17, %v395_v3  ;;  %v404_v50 = vadd.f32 %v403_v22, %v402_v26  ;;  %v412_v11 = vadd.f32 %v411_v23, %v410_v63  ;;  %v393_v60 = vor.u32 %v392_v46, %v391_v55 }
  0x73   :  { %v420_v15 = vadd.f32 %v419_v25, %v418_v2  ;;  %v428_v49 = vadd.f32 %v427_v31, %v426_v56  ;;  %v436_v18 = vadd.f32 %v435_v35, %v434_v61  ;;  %v286_v14 = vsel %vm284_vm12, %v182_v19, %v794_v7 }
  0x74   :  { %v398_v3 = vmax.f32 %v397_v5, 0.0  ;;  %v405_v17 = vmax.f32 %v404_v50, 0.0  ;;  %v413_v26 = vmax.f32 %v412_v11, 0.0  ;;  %v180_v63 = vsel %vm178_vm11, %v792_v59, %v179_v53 }
  0x75   :  { %v421_v46 = vmax.f32 %v420_v15, 0.0  ;;  %v429_v55 = vmax.f32 %v428_v49, 0.0  ;;  %v444_v56 = vmul.f32 %v443_v44, %v393_v60  ;;  %v451_v2 = vmul.f32 %v450_v47, %v393_v60 }
  0x76   :  { %v400_v61 = vmul.f32 %v399_v29, %v398_v3  ;;  %v407_v7 = vmul.f32 %v406_v33, %v405_v17  ;;  %v415_v19 = vmul.f32 %v1544_v34, %v413_v26  ;;  %v283_v15 = vsel %vm281_vm8, %v792_v59, %v179_v53 }
  0x77   :  { %v423_v5 = vmul.f32 %v1545_v13, %v421_v46  ;;  %v437_v50 = vmax.f32 %v436_v18, 0.0  ;;  %v446_v17 = vadd.f32 %v445_v1, %v444_v56  ;;  %v453_v49 = vadd.f32 %v452_v10, %v451_v2 }
  0x78   :  { %v408_v11 = vadd.f32 %v407_v7, %v400_v61  ;;  %v459_v3 = vmul.f32 %v458_v48, %v393_v60  ;;  %v467_v26 = vmul.f32 %v466_v38, %v393_v60  ;;  %v431_v34 = vmul.f32 %v1546_v39, %v429_v55 }
  0x79   :  { %v447_v59 = vmax.f32 %v446_v17, 0.0  ;;  %v475_v53 = vmul.f32 %v1557_v62, %v393_v60  ;;  %v483_v46 = vmul.f32 %v1556_v41, %v393_v60  ;;  %v454_v13 = vmax.f32 %v453_v49, 0.0 }
  0x7a   :  { %v416_v18 = vadd.f32 %v415_v19, %v408_v11  ;;  %v461_v56 = vadd.f32 %v460_v27, %v459_v3  ;;  %v469_v61 = vadd.f32 %v468_v21, %v467_v26  ;;  %v439_v7 = vmul.f32 %v1553_v40, %v437_v50 }
  0x7b   :  { %v449_v2 = vmul.f32 %v448_v57, %v447_v59  ;;  %v477_v55 = vadd.f32 %v1555_v4, %v475_v53  ;;  %v485_v17 = vadd.f32 %v1554_v58, %v483_v46  ;;  %v456_v60 = vmul.f32 %v455_v16, %v454_v13 }
  0x7c   :  { %v424_v39 = vadd.f32 %v423_v5, %v416_v18  ;;  %v462_v19 = vmax.f32 %v461_v56, 0.0  ;;  %v470_v11 = vmax.f32 %v469_v61, 0.0  ;;  %v184_v50 = vsel %vm177_vm13, %v180_v63, %v183_v28 }
  0x7d   :  { %v287_v49 = vsel %vm280_vm14, %v283_v15, %v286_v14  ;;  %v478_v3 = vmax.f32 %v477_v55, 0.0  ;;  %v486_v26 = vmax.f32 %v485_v17, 0.0  ;;  %v457_v53 = vadd.f32 %v456_v60, %v449_v2 }
  0x7e   :  { %v432_v59 = vadd.f32 %v431_v34, %v424_v39  ;;  %v464_v5 = vmul.f32 %v1552_v32, %v462_v19  ;;  %v472_v13 = vmul.f32 %v1551_v6, %v470_v11  ;;  %v1548_v46 = vstv %s1251_s8 }
  0x7f   :  { %v1549_v18 = vstv %s1253_s6  ;;  %v480_v52 = vmul.f32 %v1550_v20, %v478_v3  ;;  %v1303_v14 = vsel %vm174_vm15, nan, %v184_v50  ;;  %v1307_v34 = vsel %vm174_vm15, nan, %v287_v49 }
  0x80   :  { %v440_v56 = vadd.f32 %v439_v7, %v432_v59  ;;  %v465_v61 = vadd.f32 %v464_v5, %v457_v53  ;;  %v488_v28 = vmul.f32 %v1549_v18, %v486_v26  ;;  %v499_v63 = vsub.f32 %v1195_v24, %v1199_v42 }
  0x81   :  { %v1316_v15 = vmul.f32 0.029, %v1307_v34  ;;  %v504_v55 = vmul.f32 %v908_v30, %v913_v37  ;;  %v1547_v17 = vstv %s1287_s9  ;;  %v511_v50 = vmul.f32 %v908_v30, %v911_v36  ;;  %s1594_s9 = sld [smem:[#allocation13_spill]] }
  0x82   :  { %v442_v39 = vadd.f32 %v1548_v46, %v440_v56  ;;  %v473_v43 = vadd.f32 %v472_v13, %v465_v61 }
  0x83   :  { %v505_v42 = vmul.f32 0.01, %v504_v55  ;;  %v512_v59 = vmul.f32 0.01, %v511_v50 }
  0x84   :  { %v481_v7 = vadd.f32 %v480_v52, %v473_v43  ;;  %v500_v2 = vmul.f32 %v442_v39, %v1303_v14  ;;  %v507_v11 = vmul.f32 %v442_v39, %v1307_v34  ;;  %v514_v3 = vmul.f32 %v442_v39, %v1316_v15 }
  0x86   :  { %v489_v60 = vadd.f32 %v488_v28, %v481_v7  ;;  %v501_v19 = vsub.f32 %v499_v63, %v500_v2 }
  0x88   :  { %v491_v49 = vadd.f32 %v1547_v17, %v489_v60  ;;  %v502_v24 = vmul.f32 0.24390244, %v501_v19 }
  0x8a   :  { %v508_v26 = vadd.f32 %v507_v11, %v491_v49  ;;  %v515_v53 = vmul.f32 0.033, %v491_v49  ;;  %v1328_v5 = vadd.f32 %v505_v42, %v502_v24 }
  0x8c   :  { %v509_v13 = vmul.f32 0.24390244, %v508_v26  ;;  %v516_v56 = vsub.f32 %v514_v3, %v515_v53  ;;  %v1336_v43 = vadd.f32 %v1328_v5, %v911_v36 }
  0x8e   :  { %v1330_v61 = vsub.f32 %v509_v13, %v512_v59  ;;  %v1332_v52 = vmul.f32 359.71222, %v516_v56  ;;  %v1350_v19 = vand.u32 2147483647, %v1336_v43  ;;  %vm554_vm1 = vcmp.lt.s32.totalorder %v1336_v43, 0 }
  0x8f   :  { %vm558_vm2 = vcmp.ne.f32.partialorder %v1336_v43, %v1336_v43  ;;  %vm551_vm5 = vcmp.lt.f32.partialorder %v1336_v43, 0.0 }
  0x90   :  { %v520_v28 = vadd.f32 %v1330_v61, %v913_v37  ;;  %v521_v39 = vadd.f32 %v1332_v52, %v908_v30  ;;  %vm564_vm7 = vcmp.eq.s32.totalorder %v1350_v19, inf }
  0x92   :  { %v522_v63 = vmul.f32 0.029, %v521_v39  ;;  %v572_v7 = vmul.f32 0.033, %v521_v39  ;;  %v1342_v2 = vmul.f32 %v521_v39, %v520_v28  ;;  %v1345_v55 = vmul.f32 %v521_v39, %v1336_v43 }
  0x94   :  { %v1347_v60 = vadd.f32 %v522_v63, %v520_v28  ;;  %v1352_v36 = vsub.f32 %v572_v7, %v520_v28 }
  0x96   :  { %v1355_v11 = vand.u32 2147483647, %v1347_v60  ;;  %v1358_v37 = vand.u32 2147483647, %v1352_v36  ;;  %vm559_vm3 = vcmp.ne.f32.partialorder %v1347_v60, %v1347_v60  ;;  %vm609_vm6 = vcmp.ne.f32.partialorder %v1352_v36, %v1352_v36 }
  0x97   :  { %vm556_vm9 = vcmp.eq.f32.partialorder %v1347_v60, 0.0  ;;  %vm1387_vm11 = vmor %vm558_vm2, %vm559_vm3  ;;  %vm606_vm10 = vcmp.eq.f32.partialorder %v1352_v36, 0.0 }
  0x98   :  { %v527_v30 = vmax.f32 %v1350_v19, %v1355_v11  ;;  %v577_v50 = vmax.f32 %v1350_v19, %v1358_v37  ;;  %v526_v49 = vmin.f32 %v1350_v19, %v1355_v11  ;;  %v576_v24 = vmin.f32 %v1350_v19, %v1358_v37  ;;  %vm610_vm13 = vmor %vm558_vm2, %vm609_vm6 }
  0x99   :  { %vm548_vm0 = vcmp.gt.f32.partialorder %v1355_v11, %v1350_v19  ;;  %vm598_vm4 = vcmp.gt.f32.partialorder %v1358_v37, %v1350_v19  ;;  %vm565_vm8 = vcmp.eq.s32.totalorder %v1355_v11, inf  ;;  %vm615_vm12 = vcmp.eq.s32.totalorder %v1358_v37, inf }
  0x9a   :  { %795 = vrcp.f32 %v527_v30  ;;  %v1593_v11 = vmov 0.7853982   ;;  %vm566_vm14 = vmand %vm564_vm7, %vm565_vm8 }
  0x9b   :  { %797 = vrcp.f32 %v577_v50  ;;  %vm616_vm15 = vmand %vm564_vm7, %vm615_vm12 }
  0xa4   :  { %v796_v42 = vpop.eup %795 }
  0xa5   :  { %v798_v3 = vpop.eup %797  ;;  %v529_v26 = vmul.f32 %v796_v42, %v526_v49 }
  0xa6   :  { %v579_v59 = vmul.f32 %v798_v3, %v576_v24 }
  0xa7   :  { %v530_v53 = vmul.f32 %v529_v26, %v529_v26 }
  0xa8   :  { %v580_v13 = vmul.f32 %v579_v59, %v579_v59 }
  0xa9   :  { %v531_v56 = vmul.f32 0.002785687, %v530_v53 }
  0xaa   :  { %v581_v28 = vmul.f32 0.002785687, %v580_v13 }
  0xab   :  { %v532_v39 = vadd.f32 -0.015866, %v531_v56 }
  0xac   :  { %v582_v63 = vadd.f32 -0.015866, %v581_v28 }
  0xad   :  { %v533_v7 = vmul.f32 %v532_v39, %v530_v53 }
  0xae   :  { %v583_v17 = vmul.f32 %v582_v63, %v580_v13 }
  0xaf   :  { %v534_v30 = vadd.f32 0.04247222, %v533_v7 }
  0xb0   :  { %v584_v50 = vadd.f32 0.04247222, %v583_v17 }
  0xb1   :  { %v535_v46 = vmul.f32 %v534_v30, %v530_v53 }
  0xb2   :  { %v585_v18 = vmul.f32 %v584_v50, %v580_v13 }
  0xb3   :  { %v536_v20 = vadd.f32 -0.074975304, %v535_v46 }
  0xb4   :  { %v586_v6 = vadd.f32 -0.074975304, %v585_v18 }
  0xb5   :  { %v537_v32 = vmul.f32 %v536_v20, %v530_v53 }
  0xb6   :  { %v587_v40 = vmul.f32 %v586_v6, %v580_v13 }
  0xb7   :  { %v538_v58 = vadd.f32 0.1064488, %v537_v32 }
  0xb8   :  { %v588_v4 = vadd.f32 0.1064488, %v587_v40 }
  0xb9   :  { %v539_v49 = vmul.f32 %v538_v58, %v530_v53  ;;  %v1602_v58 = vstv %s1594_s9 }
  0xba   :  { %v589_v24 = vmul.f32 %v588_v4, %v580_v13  ;;  %v555_v4 = vsel %vm554_vm1, 3.1415927, %v869_v54 }
  0xbb   :  { %v540_v42 = vadd.f32 -0.14207031, %v539_v49 }
  0xbc   :  { %v590_v3 = vadd.f32 -0.14207031, %v589_v24  ;;  %v569_v24 = vand.u32 2147483648, %v1347_v60 }
  0xbd   :  { %v541_v41 = vmul.f32 %v540_v42, %v530_v53 }
  0xbe   :  { %v591_v62 = vmul.f32 %v590_v3, %v580_v13 }
  0xbf   :  { %v542_v56 = vadd.f32 0.19993454, %v541_v41 }
  0xc0   :  { %v592_v28 = vadd.f32 0.19993454, %v591_v62 }
  0xc1   :  { %v543_v39 = vmul.f32 %v542_v56, %v530_v53 }
  0xc2   :  { %v593_v63 = vmul.f32 %v592_v28, %v580_v13  ;;  %v619_v28 = vand.u32 2147483648, %v1352_v36 }
  0xc3   :  { %v544_v7 = vadd.f32 -0.33333147, %v543_v39 }
  0xc4   :  { %v594_v17 = vadd.f32 -0.33333147, %v593_v63 }
  0xc5   :  { %v545_v30 = vmul.f32 %v544_v7, %v530_v53  ;;  %v563_v53 = vsel %vm551_vm5, 2.3561945, %v1593_v11 }
  0xc6   :  { %v595_v50 = vmul.f32 %v594_v17, %v580_v13 }
  0xc7   :  { %v546_v46 = vmul.f32 %v545_v30, %v529_v26  ;;  %v681_v30 = vmul.f32 %v1336_v43, %v1336_v43 }
  0xc8   :  { %v596_v18 = vmul.f32 %v595_v50, %v579_v59 }
  0xc9   :  { %v547_v20 = vadd.f32 %v546_v46, %v529_v26 }
  0xca   :  { %v597_v40 = vadd.f32 %v596_v18, %v579_v59 }
  0xcb   :  { %v549_v32 = vsub.f32 1.5707964, %v547_v20 }
  0xcc   :  { %v599_v6 = vsub.f32 1.5707964, %v597_v40 }
  0xcd   :  { %v550_v62 = vsel %vm548_vm0, %v549_v32, %v547_v20  ;;  %v1599_v32 = vstv %s989_s29  ;;  %s1610_s29 = sld [smem:[#allocation23_spill]] }
  0xce   :  { %v552_v41 = vsub.f32 3.1415927, %v550_v62  ;;  %v600_v26 = vsel %vm598_vm4, %v599_v6, %v597_v40 }
  0xcf   :  { %v602_v59 = vsub.f32 3.1415927, %v600_v26 }
  0xd0   :  { %v553_v54 = vsel %vm551_vm5, %v552_v41, %v550_v62  ;;  %v1600_v62 = vstv %s992_s30  ;;  %v1601_v41 = vstv %s994_s3  ;;  %s1614_s30 = sld [smem:[#allocation24_spill]]  ;;  %s1616_s3 = sld [smem:[#allocation22_spill]] }
  0xd1   :  { %v557_v13 = vsel %vm556_vm9, %v555_v4, %v553_v54  ;;  %v603_v37 = vsel %vm551_vm5, %v602_v59, %v600_v26 }
  0xd2   :  { %v561_v49 = vsel %vm1387_vm11, nan, %v557_v13  ;;  %v607_v42 = vsel %vm606_vm10, %v555_v4, %v603_v37 }
  0xd3   :  { %v567_v3 = vsel %vm566_vm14, %v563_v53, %v561_v49  ;;  %v611_v56 = vsel %vm610_vm13, nan, %v607_v42 }
  0xd4   :  { %v568_v19 = vand.u32 2147483647, %v567_v3  ;;  %v617_v39 = vsel %vm616_vm15, %v563_v53, %v611_v56  ;;  %v1609_v3 = vstv %s1584_s4 }
  0xd5   :  { %v618_v63 = vand.u32 2147483647, %v617_v39  ;;  %v1611_v39 = vstv %s1065_s20 }
  0xd6   :  { %v570_v7 = vor.u32 %v569_v24, %v568_v19  ;;  %v1608_v24 = vstv %s1025_s12 }
  0xd7   :  { %v620_v17 = vor.u32 %v619_v28, %v618_v63 }
  0xd8   :  { %v571_v60 = vsub.f32 %v902_v0, %v570_v7 }
  0xd9   :  { %v651_v36 = vmul.f32 %v620_v17, %v443_v44  ;;  %v655_v50 = vmul.f32 %v620_v17, %v450_v47  ;;  %v660_v46 = vmul.f32 %v620_v17, %v458_v48  ;;  %v665_v18 = vmul.f32 %v620_v17, %v466_v38 }
  0xda   :  { %v621_v20 = vmul.f32 %v571_v60, %v394_v8  ;;  %v625_v40 = vmul.f32 %v571_v60, %v401_v9  ;;  %v630_v0 = vmul.f32 %v571_v60, %v409_v12  ;;  %v635_v6 = vmul.f32 %v571_v60, %v1599_v32 }
  0xdb   :  { %v640_v4 = vmul.f32 %v571_v60, %v1600_v62  ;;  %v645_v44 = vmul.f32 %v571_v60, %v1601_v41  ;;  %v652_v47 = vadd.f32 %v651_v36, %v445_v1  ;;  %v656_v48 = vadd.f32 %v655_v50, %v452_v10 }
  0xdc   :  { %v622_v38 = vadd.f32 %v621_v20, %v1602_v58  ;;  %v626_v8 = vadd.f32 %v625_v40, %v403_v22  ;;  %v631_v9 = vadd.f32 %v630_v0, %v411_v23  ;;  %v636_v12 = vadd.f32 %v635_v6, %v419_v25 }
  0xdd   :  { %v641_v26 = vadd.f32 %v640_v4, %v427_v31  ;;  %v646_v1 = vadd.f32 %v645_v44, %v435_v35  ;;  %v653_v59 = vmax.f32 %v652_v47, 0.0  ;;  %v657_v10 = vmax.f32 %v656_v48, 0.0 }
  0xde   :  { %v623_v54 = vmax.f32 %v622_v38, 0.0  ;;  %v627_v11 = vmax.f32 %v626_v8, 0.0  ;;  %v632_v22 = vmax.f32 %v631_v9, 0.0  ;;  %v637_v53 = vmax.f32 %v636_v12, 0.0 }
  0xdf   :  { %v642_v23 = vmax.f32 %v641_v26, 0.0  ;;  %v654_v13 = vmul.f32 %v653_v59, %v448_v57  ;;  %v658_v25 = vmul.f32 %v657_v10, %v455_v16  ;;  %v1607_v31 = vstv %s1603_s7 }
  0xe0   :  { %v682_v37 = vmul.f32 %v681_v30, %v1607_v31  ;;  %v624_v35 = vmul.f32 %v623_v54, %v399_v29  ;;  %v628_v49 = vmul.f32 %v627_v11, %v406_v33  ;;  %v633_v42 = vmul.f32 %v632_v22, %v1608_v24 }
  0xe1   :  { %v638_v56 = vmul.f32 %v637_v53, %v1609_v3  ;;  %v647_v28 = vmax.f32 %v646_v1, 0.0  ;;  %v661_v57 = vadd.f32 %v660_v46, %v460_v27  ;;  %v666_v16 = vadd.f32 %v665_v18, %v468_v21 }
  0xe2   :  { %v629_v19 = vadd.f32 %v628_v49, %v624_v35  ;;  %v670_v63 = vmul.f32 %v620_v17, %v1611_v39  ;;  %v1612_v29 = vstv %s1087_s24  ;;  %v1613_v60 = vstv %s1605_s27 }
  0xe3   :  { %v675_v7 = vmul.f32 %v620_v17, %v1612_v29  ;;  %v643_v33 = vmul.f32 %v642_v23, %v1613_v60  ;;  %v659_v30 = vadd.f32 %v658_v25, %v654_v13  ;;  %v662_v36 = vmax.f32 %v661_v57, 0.0 }
  0xe4   :  { %v1615_v50 = vstv %s1606_s28  ;;  %v634_v40 = vadd.f32 %v633_v42, %v629_v19  ;;  %v667_v0 = vmax.f32 %v666_v16, 0.0  ;;  %v1617_v32 = vstv %s1116_s15 }
  0xe5   :  { %v683_v20 = vadd.f32 %v682_v37, %v1615_v50  ;;  %v671_v27 = vadd.f32 %v670_v63, %v1617_v32  ;;  %v1618_v46 = vstv %s1118_s14  ;;  %v1619_v62 = vstv %s1589_s10 }
  0xe6   :  { %v676_v6 = vadd.f32 %v675_v7, %v1618_v46  ;;  %v648_v21 = vmul.f32 %v647_v28, %v1619_v62  ;;  %v1621_v18 = vstv %s1099_s0  ;;  %v639_v17 = vadd.f32 %v638_v56, %v634_v40  ;;  %s871_s0 = smov [#allocation7]  }
  0xe7   :  { %v663_v4 = vmul.f32 %v662_v36, %v1621_v18  ;;  %v1622_v41 = vstv %s1610_s29  ;;  %v672_v47 = vmax.f32 %v671_v27, 0.0  ;;  %v1624_v8 = vstv %s1614_s30  ;;  %s715_s4 = sshll.u32 %s871_s0, 4  ;;  %s716_s4 = int_to_ptr.vmem [resolvable:$true] %s715_s4 }
  0xe8   :  { %v668_v44 = vmul.f32 %v667_v0, %v1622_v41  ;;  %v677_v48 = vmax.f32 %v676_v6, 0.0  ;;  %v644_v38 = vadd.f32 %v643_v33, %v639_v17  ;;  %v684_v12 = vadd.f32 %v683_v20, %v1101_v45  ;;  %s833_s5 = scalar_lea.vmem %s716_s4, 64  ;;  %p838_p0 = scmp.lt.s32.totalorder %s716_s4, %s716_s4 }
  0xe9   :  { %v664_v58 = vadd.f32 %v663_v4, %v659_v30  ;;  %v673_v9 = vmul.f32 %v672_v47, %v1624_v8  ;;  %v685_v26 = vmul.f32 %v1336_v43, %v1106_v51  ;;  %v1625_v59 = vstv %s1616_s3  ;;  %p834_p13 = scmp.ne.s32.totalorder %s716_s4, %s833_s5  ;;  %p839_p1 = scmp.lt.s32.totalorder %s833_s5, %s833_s5 }
  0xea   :  { %v678_v10 = vmul.f32 %v677_v48, %v1625_v59  ;;  %v649_v54 = vadd.f32 %v648_v21, %v644_v38  ;;  %v1626_v22 = vstv %s1620_s2  ;;  %v1627_v37 = vstv %s1623_s25 }
  0xeb   :  { %v669_v1 = vadd.f32 %v668_v44, %v664_v58  ;;  %v686_v23 = vsub.f32 %v684_v12, %v685_v26  ;;  %v692_v42 = vmul.f32 0.01, %v1342_v2  ;;  %v699_v56 = vmul.f32 0.01, %v1345_v55  ;;  %p840_p2 = por %p839_p1, %p838_p0 }
  0xec   :  { %v650_v53 = vadd.f32 %v649_v54, %v1626_v22 }
  0xed   :  { %v674_v11 = vadd.f32 %v673_v9, %v669_v1  ;;  %p841_p3 = pnand %p840_p2, %p834_p13 }
  0xee   :  { %v687_v25 = vmul.f32 %v650_v53, %v1303_v14  ;;  %v694_v31 = vmul.f32 %v650_v53, %v1307_v34  ;;  %v701_v45 = vmul.f32 %v650_v53, %v1316_v15 }
  0xef   :  { %v679_v13 = vadd.f32 %v678_v10, %v674_v11 }
  0xf0   :  { %v688_v49 = vsub.f32 %v686_v23, %v687_v25 }
  0xf1   :  { %v680_v35 = vadd.f32 %v679_v13, %v1627_v37 }
  0xf2   :  { %v689_v43 = vmul.f32 0.24390244, %v688_v49 }
  0xf3   :  { %v695_v24 = vadd.f32 %v694_v31, %v680_v35  ;;  %v702_v51 = vmul.f32 0.033, %v680_v35 }
  0xf4   :  { %v690_v57 = vadd.f32 %v689_v43, %v1328_v5 }
  0xf5   :  { %v696_v3 = vmul.f32 0.24390244, %v695_v24  ;;  %v703_v28 = vsub.f32 %v701_v45, %v702_v51 }
  0xf6   :  { %v693_v19 = vadd.f32 %v692_v42, %v690_v57 }
  0xf7   :  { %v697_v14 = vadd.f32 %v696_v3, %v1330_v61  ;;  %v704_v34 = vmul.f32 359.71222, %v703_v28 }
  0xf8   :  { %706 = vst [vmem:[#allocation7] sm:$0x1] %v693_v19 }
  0xf9   :  { %v700_v16 = vsub.f32 %v697_v14, %v699_v56  ;;  %v705_v15 = vadd.f32 %v704_v34, %v1332_v52 }
  0xfb   :  { %707 = vst [vmem:[#allocation7 + $0x1] sm:$0x1] %v700_v16  ;;  %708 = vst [vmem:[#allocation7 + $0x2] sm:$0x1] %v705_v15 }
  0xfc   :  { %844 = shalt.err (!%p841_p3)
}
  0xfd   :  { %s1628_s9 = sld [smem:[#allocation25_spill]] }
 0x103   :  { %s845_s10 = scalar_lea.hbm %s1628_s9, 64 }
 0x104   :  { %p846_p4 = scmp.ne.s32.totalorder %s1628_s9, %s845_s10  ;;  %p849_p5 = scmp.lt.u32.totalorder %s845_s10, %s1628_s9 }
 0x106   :  { %p851_p6 = pnand %p849_p5, %p846_p4 }
 0x108   :  { %854 = shalt.err (!%p851_p6)
}
 0x109   :  { %718 = dma.vmem_to_hbm [thread:$0]  %s716_s4, 64, %s1628_s9, [#allocation4]  }
 0x10a   :  { %859 = dma.done.wait [#allocation4], 64  }
 0x10b   :  { %860 = vsyncadd [#allocation4], 4294967232 }
 0x10c   :  { %722 = vsyncpa [#allocation3], 1 }
 0x10d   :  { %723 = vsyncpa [#allocation4], 1 }
 0x10e   :  { %724 = vsyncpa [#allocation5], 1 }

</bundles_post_ra>
